<compile_context>
chip_gen: v6e
topology: v6e:2x2x1
jax: 0.10.0
libtpu: 0.0.40
codegen_flags: <defaults>
</compile_context>

<pallas_src>
import numpy as np
import jax
import jax.numpy as jnp
from jax.experimental import pallas as pl
from jax.experimental.pallas import tpu as pltpu

F32 = jnp.float32
BF16 = jnp.bfloat16
EPS = 1e-5
NUM_GROUPS = 32
COUT = 256
_VMEM_CAP = 56 << 20            # stay under v7x's 64 MiB physical VMEM
_MIN_ROWS_PER_STEP = 2048       # keep per-grid-step rows above grid-step overhead


def _cparams(vmem_est_bytes):
    return pltpu.CompilerParams(
        dimension_semantics=("parallel",),
        vmem_limit_bytes=int(min(max(vmem_est_bytes, 16 << 20), _VMEM_CAP)),
    )


def _choose_nblk(BT, rows_per_sample):
    """Smallest per-step batch (divisor of BT) giving >= _MIN_ROWS_PER_STEP rows."""
    bt_blk = BT
    for d in range(1, BT + 1):
        if BT % d == 0 and d * rows_per_sample >= _MIN_ROWS_PER_STEP:
            bt_blk = d
            break
    return BT // bt_blk


# ---------------------------------------------------------------------------
# In-kernel helper: masked 1x1-conv (bf16 MXU, f32 acc) + GroupNorm(32, 256)
# folded to a single scale/shift FMA (no materialized d3 temp).
# ---------------------------------------------------------------------------
def _conv_gn(x_ref, vm_ref, w_ref, b_ref, g_ref, be_ref, gsel_ref, gselT_ref):
    bt_blk, hw, cin = x_ref.shape
    cout = w_ref.shape[1]
    vm = vm_ref[...]                                               # (bt_blk, 1, 1) f32
    xm = x_ref[...] * vm.astype(BF16)                              # mask BEFORE conv (ref order); 0/1 mask -> exact in bf16
    y2 = jnp.dot(xm.reshape(bt_blk * hw, cin), w_ref[...],         # bf16 MXU, f32 acc
                 preferred_element_type=F32) + b_ref[...]
    y3 = y2.reshape(bt_blk, hw, cout)

    # One-pass statistics: sublane reduces + tiny one-hot group matmuls.
    # NOTE: E[x^2]-E[x]^2 (clamped) is used instead of two-pass; activations after a
    # 1x1 conv of normalized features are modest, so f32 cancellation is benign here.
    inv_cnt = 1.0 / float(hw * (cout // NUM_GROUPS))
    gsel, gselT = gsel_ref[...], gselT_ref[...]
    sum_c = jnp.sum(y3, axis=1)                                    # (bt_blk, 256)
    sq_c = jnp.sum(y3 * y3, axis=1)                                # (bt_blk, 256)
    mean_g = jnp.dot(sum_c, gsel, preferred_element_type=F32) * inv_cnt    # (bt_blk, 32)
    ex2_g = jnp.dot(sq_c, gsel, preferred_element_type=F32) * inv_cnt
    var_g = jnp.maximum(ex2_g - mean_g * mean_g, 0.0)
    rstd_g = jax.lax.rsqrt(var_g + EPS)
    mean_c = jnp.dot(mean_g, gselT, preferred_element_type=F32)            # (bt_blk, 256)
    rstd_c = jnp.dot(rstd_g, gselT, preferred_element_type=F32)
    scale_c = rstd_c * g_ref[...]
    shift_c = be_ref[...] - mean_c * scale_c
    yn3 = y3 * scale_c[:, None, :] + shift_c[:, None, :]           # single FMA per element
    return yn3, vm


# ---------------------------------------------------------------------------
# Kernel A: stride-4 scale, fused with the audio branch and the decoder head.
# ---------------------------------------------------------------------------
def _scale1_kernel(x_ref, vm_ref, w_ref, b_ref, g_ref, be_ref, gsel_ref, gselT_ref,
                   a_ref, aw_ref, ab_ref, ag_ref, abe_ref, decw_ref,
                   o_ref, ao_ref, fuse_ref):
    yn3, vm = _conv_gn(x_ref, vm_ref, w_ref, b_ref, g_ref, be_ref, gsel_ref, gselT_ref)
    o_ref[...] = yn3.astype(o_ref.dtype)

    # fused decoder-head stub (256 -> 1) on the tile already resident in VMEM
    bt_blk, hw, cout = yn3.shape
    decw = decw_ref[...].reshape(1, 1, cout)
    fuse = jnp.sum(yn3 * decw, axis=-1)                            # (bt_blk, hw) lane reduce
    fuse_ref[...] = fuse[:, None, :].astype(fuse_ref.dtype)

    # fused audio branch: Linear(128->256) + LayerNorm + temporal mask (tiny, f32)
    a = a_ref[...].reshape(bt_blk, a_ref.shape[2]).astype(F32)     # (bt_blk, 128)
    ya = jnp.dot(a, aw_ref[...], preferred_element_type=F32) + ab_ref[...]
    mu = jnp.mean(ya, axis=-1, keepdims=True)
    d = ya - mu
    var = jnp.mean(d * d, axis=-1, keepdims=True)
    yan = d * jax.lax.rsqrt(var + EPS) * ag_ref[...] + abe_ref[...]
    ao_ref[...] = (yan * vm.reshape(bt_blk, 1))[:, None, :].astype(ao_ref.dtype)


# ---------------------------------------------------------------------------
# Kernel B: generic scale (in_proj2..4 = 1x1 conv + GroupNorm(32, 256)).
# ---------------------------------------------------------------------------
def _proj_gn_kernel(x_ref, vm_ref, w_ref, b_ref, g_ref, be_ref, gsel_ref, gselT_ref, o_ref):
    yn3, _ = _conv_gn(x_ref, vm_ref, w_ref, b_ref, g_ref, be_ref, gsel_ref, gselT_ref)
    o_ref[...] = yn3.astype(o_ref.dtype)


def _param_specs(cin, cout):
    return [
        pl.BlockSpec((cin, cout), lambda i: (0, 0)),               # conv weight (bf16)
        pl.BlockSpec((1, cout), lambda i: (0, 0)),                 # conv bias
        pl.BlockSpec((1, cout), lambda i: (0, 0)),                 # GN gamma
        pl.BlockSpec((1, cout), lambda i: (0, 0)),                 # GN beta
        pl.BlockSpec((cout, NUM_GROUPS), lambda i: (0, 0)),        # gsel
        pl.BlockSpec((NUM_GROUPS, cout), lambda i: (0, 0)),        # gsel^T
    ]


def _proj_vmem_est(bt_blk, hw, cin, cout):
    return (2 * bt_blk * hw * (cin + cout) * 2      # double-buffered bf16 in/out
            + 3 * bt_blk * hw * cout * 4            # f32 y3 + transient temps
            + (4 << 20))                            # params / headroom


def conv1x1_groupnorm(x, vmask3, w_bf16, b, gamma, beta, gsel, gselT, *, nblk):
    BT, hw, cin = x.shape
    cout = w_bf16.shape[1]
    bt_blk = BT // nblk
    return pl.pallas_call(
        _proj_gn_kernel,
        out_shape=jax.ShapeDtypeStruct((BT, hw, cout), BF16),
        grid=(nblk,),
        in_specs=[pl.BlockSpec((bt_blk, hw, cin), lambda i: (i, 0, 0)),
                  pl.BlockSpec((bt_blk, 1, 1), lambda i: (i, 0, 0))]
                 + _param_specs(cin, cout),
        out_specs=pl.BlockSpec((bt_blk, hw, cout), lambda i: (i, 0, 0)),
        compiler_params=_cparams(_proj_vmem_est(bt_blk, hw, cin, cout)),
    )(x, vmask3, w_bf16, b, gamma, beta, gsel, gselT)


def scale1_fused(x, vmask3, audio3, params, gsel, gselT, *, nblk):
    BT, hw, cin = x.shape
    cout = COUT
    bt_blk = BT // nblk
    ain = audio3.shape[-1]
    in_specs = ([pl.BlockSpec((bt_blk, hw, cin), lambda i: (i, 0, 0)),
                 pl.BlockSpec((bt_blk, 1, 1), lambda i: (i, 0, 0))]
                + _param_specs(cin, cout)
                + [pl.BlockSpec((bt_blk, 1, ain), lambda i: (i, 0, 0)),   # audio embed
                   pl.BlockSpec((ain, cout), lambda i: (0, 0)),           # audio W
                   pl.BlockSpec((1, cout), lambda i: (0, 0)),             # audio b
                   pl.BlockSpec((1, cout), lambda i: (0, 0)),             # LN gamma
                   pl.BlockSpec((1, cout), lambda i: (0, 0)),             # LN beta
                   pl.BlockSpec((1, cout), lambda i: (0, 0))])            # dec head W (row)
    return pl.pallas_call(
        _scale1_kernel,
        out_shape=(jax.ShapeDtypeStruct((BT, hw, cout), BF16),   # projected feature map 1
                   jax.ShapeDtypeStruct((BT, 1, cout), F32),     # audio feature
                   jax.ShapeDtypeStruct((BT, 1, hw), F32)),      # coarse fuse mask (flat)
        grid=(nblk,),
        in_specs=in_specs,
        out_specs=(pl.BlockSpec((bt_blk, hw, cout), lambda i: (i, 0, 0)),
                   pl.BlockSpec((bt_blk, 1, cout), lambda i: (i, 0, 0)),
                   pl.BlockSpec((bt_blk, 1, hw), lambda i: (i, 0, 0))),
        compiler_params=_cparams(_proj_vmem_est(bt_blk, hw, cin, cout) + (2 << 20)),
    )(x, vmask3, params["proj1_w"], params["proj1_b"],
      params["proj1_gamma"], params["proj1_beta"], gsel, gselT,
      audio3, params["audio_w"], params["audio_b"],
      params["audio_gamma"], params["audio_beta"], params["dec_w_row"])


# ---------------------------------------------------------------------------
# Kernel C: bilinear (align_corners=True) upsample + temporal mask, batched.
# ---------------------------------------------------------------------------
def _bilerp_kernel(x_ref, rh_ref, rwt_ref, vm_ref, o_ref):
    bt_blk, h4, w4 = x_ref.shape
    Wout = rwt_ref.shape[1]
    x3 = x_ref[...].astype(F32)
    t2 = jnp.dot(x3.reshape(bt_blk * h4, w4), rwt_ref[...],
                 preferred_element_type=F32)                       # one (bt*h4, W) matmul
    t3 = t2.reshape(bt_blk, h4, Wout)
    vm = vm_ref[...].astype(F32)
    rh = rh_ref[...]
    for b in range(bt_blk):                                        # small static loop; avoids
        y = jnp.dot(rh, t3[b], preferred_element_type=F32)         # broadcasting rh across batch
        o_ref[b] = (y * vm[b]).astype(o_ref.dtype)


def bilinear_upsample_mask(x, rh, rwt, vmask3, *, nblk):
    BT, h4, w4 = x.shape
    Hout, Wout = rh.shape[0], rwt.shape[1]
    bt_blk = BT // nblk
    est = (2 * bt_blk * (h4 * w4 + Hout * Wout) * 4
           + 2 * bt_blk * Hout * Wout * 4 + (2 << 20))
    return pl.pallas_call(
        _bilerp_kernel,
        out_shape=jax.ShapeDtypeStruct((BT, Hout, Wout), F32),
        grid=(nblk,),
        in_specs=[pl.BlockSpec((bt_blk, h4, w4), lambda i: (i, 0, 0)),
                  pl.BlockSpec((Hout, h4), lambda i: (0, 0)),
                  pl.BlockSpec((w4, Wout), lambda i: (0, 0)),
                  pl.BlockSpec((bt_blk, 1, 1), lambda i: (i, 0, 0))],
        out_specs=pl.BlockSpec((bt_blk, Hout, Wout), lambda i: (i, 0, 0)),
        compiler_params=_cparams(est),
    )(x, rh, rwt, vmask3)


# ---------------------------------------------------------------------------
# Hoisted constants (built once, outside the traced call path)
# ---------------------------------------------------------------------------
def _interp_matrix_np(out_size, in_size):
    m = np.zeros((out_size, in_size), np.float32)
    if in_size == 1:
        m[:, 0] = 1.0
        return m
    if out_size == 1:
        src = np.zeros((1,), np.float64)
    else:
        src = np.arange(out_size, dtype=np.float64) * (in_size - 1) / (out_size - 1)
    lo = np.clip(np.floor(src).astype(np.int64), 0, in_size - 2)
    frac = (src - lo).astype(np.float32)
    m[np.arange(out_size), lo] += 1.0 - frac
    m[np.arange(out_size), lo + 1] += frac
    return m


def build_selm_constants(input_hw):
    H, W = input_hw
    rows = np.arange(COUT)
    gsel = np.zeros((COUT, NUM_GROUPS), np.float32)
    gsel[rows, rows // (COUT // NUM_GROUPS)] = 1.0
    rh = _interp_matrix_np(H, H // 4)
    rwt = _interp_matrix_np(W, W // 4).T
    return {"gsel": jnp.asarray(gsel), "gselT": jnp.asarray(np.ascontiguousarray(gsel.T)),
            "rh": jnp.asarray(rh), "rwt": jnp.asarray(np.ascontiguousarray(rwt))}


# ---------------------------------------------------------------------------
# Stubs for external sub-modules (not part of the reference source)
# ---------------------------------------------------------------------------
def encoder_stub(x_masked_nchw, params):
    # TODO(synk): pvt_v2_b5 backbone is an external module; deterministic multi-scale
    #             stub (strided avg-pool + fixed channel projection), emitting bf16
    #             channels-last (BT, HW, C) so no per-scale transpose and half the
    #             HBM read bytes into the projection kernels.
    BT, C, H, W = x_masked_nchw.shape
    x = jnp.transpose(x_masked_nchw, (0, 2, 3, 1))
    feats = []
    for k, (stride, cout) in enumerate(zip((4, 8, 16, 32), (64, 128, 320, 512))):
        hs, ws = H // stride, W // stride
        pooled = x.reshape(BT, hs, stride, ws, stride, C).mean(axis=(2, 4))
        f = jnp.einsum("bhwc,cd->bhwd", pooled, params[f"enc{k + 1}_w"])
        feats.append(f.reshape(BT, hs * ws, cout).astype(BF16))
    return feats


def init_params(key):
    cins = (64, 128, 320, 512)
    keys = jax.random.split(key, 16)
    p = {}
    p["audio_w"] = 0.02 * jax.random.normal(keys[0], (128, COUT), F32)
    p["audio_b"] = jnp.zeros((1, COUT), F32)
    p["audio_gamma"] = jnp.ones((1, COUT), F32)
    p["audio_beta"] = jnp.zeros((1, COUT), F32)
    ki = 1
    for k, cin in enumerate(cins):
        # 1x1-conv weights stored in bf16 ONCE (MXU operand dtype); no per-call cast.
        p[f"proj{k + 1}_w"] = (0.02 * jax.random.normal(keys[ki], (cin, COUT), F32)).astype(BF16); ki += 1
        p[f"proj{k + 1}_b"] = 0.01 * jax.random.normal(keys[ki], (1, COUT), F32); ki += 1
        p[f"proj{k + 1}_gamma"] = jnp.ones((1, COUT), F32)
        p[f"proj{k + 1}_beta"] = jnp.zeros((1, COUT), F32)
    for k, cin in enumerate(cins):
        p[f"enc{k + 1}_w"] = 0.1 * jax.random.normal(keys[ki], (3, cin), F32); ki += 1
    p["dec_w_row"] = 0.05 * jax.random.normal(keys[ki], (1, COUT), F32)
    return p


# ---------------------------------------------------------------------------
# SelM_PVT.forward equivalent
# ---------------------------------------------------------------------------
def selm_pvt_forward(params, consts, x_in, audio_embed, vid_temporal_mask_flag):
    BT, C, h, w = x_in.shape
    vmask3 = vid_temporal_mask_flag.reshape(BT, 1, 1).astype(F32)

    # x_in * vid_temporal_mask_flag, then encoder (external, stubbed)
    x_masked = x_in * vid_temporal_mask_flag.reshape(BT, 1, 1, 1)
    feats = encoder_stub(x_masked, params)           # bf16 channels-last (BT, HW_k, C_k)

    gsel, gselT = consts["gsel"], consts["gselT"]
    audio3 = audio_embed.reshape(BT, 1, audio_embed.shape[-1])

    # Kernel A: in_proj1 + GN, fused with audio_proj/audio_norm/mask and decoder head.
    feat1, audio_feat, fuse_small_flat = scale1_fused(
        feats[0], vmask3, audio3, params, gsel, gselT,
        nblk=_choose_nblk(BT, feats[0].shape[1]))

    # Kernel B: in_proj2..4 (x_k * vid_flag -> 1x1 conv -> GroupNorm(32, 256)).
    proj_feats = [feat1]
    for k in (1, 2, 3):
        proj_feats.append(conv1x1_groupnorm(
            feats[k], vmask3,
            params[f"proj{k + 1}_w"], params[f"proj{k + 1}_b"],
            params[f"proj{k + 1}_gamma"], params[f"proj{k + 1}_beta"],
            gsel, gselT, nblk=_choose_nblk(BT, feats[k].shape[1])))

    audio_tok = audio_feat.reshape(1, BT, COUT)
    # TODO(synk): BCSM temporal attention is an external module; identity stub.
    feature_map_list, audio_tok = proj_feats, audio_tok

    # TODO(synk): Decoder (token_dim=256, num_token=2) is an external module; the
    #             1-channel linear head fused into Kernel A stands in for fuse_mask.
    h4, w4 = h // 4, w // 4
    fuse_small = fuse_small_flat.reshape(BT, h4, w4)
    maps = feature_map_list

    # Kernel C: F.interpolate(bilinear, align_corners=True) * vid_flag, batched.
    fuse_mask = bilinear_upsample_mask(fuse_small, consts["rh"], consts["rwt"],
                                       vmask3, nblk=_choose_nblk(BT, h * w))
    return fuse_mask.reshape(BT, 1, h, w), feature_map_list, maps


if __name__ == "__main__":
    key = jax.random.PRNGKey(0)
    kx, ka = jax.random.split(key)

    BT, C, H, W = 2, 3, 32, 32
    x_in = jax.random.normal(kx, (BT, C, H, W), F32)
    audio_embed = jax.random.normal(ka, (BT, 128), F32)
    vid_temporal_mask_flag = jnp.array([1.0, 0.0], F32)

    params = init_params(jax.random.PRNGKey(42))
    consts = build_selm_constants((H, W))

    fuse_mask, feature_map_list, maps = selm_pvt_forward(
        params, consts, x_in, audio_embed, vid_temporal_mask_flag)
    jax.block_until_ready(fuse_mask)
    jax.block_until_ready(feature_map_list)

    assert fuse_mask.shape == (BT, 1, H, W)
    assert len(feature_map_list) == 4
    assert feature_map_list[0].shape == (BT, (H // 4) * (W // 4), 256)
    print("KERNEL_OK")
</pallas_src>

<mosaic_0001>
module attributes {stable_mosaic.version = 11 : i64} {
  func.func @_scale1_kernel(%arg0: i32, %arg1: memref<2x64x64xbf16, #tpu.memory_space<vmem>>, %arg2: memref<2x1x1xf32, #tpu.memory_space<vmem>>, %arg3: memref<64x256xbf16, #tpu.memory_space<vmem>>, %arg4: memref<1x256xf32, #tpu.memory_space<vmem>>, %arg5: memref<1x256xf32, #tpu.memory_space<vmem>>, %arg6: memref<1x256xf32, #tpu.memory_space<vmem>>, %arg7: memref<256x32xf32, #tpu.memory_space<vmem>>, %arg8: memref<32x256xf32, #tpu.memory_space<vmem>>, %arg9: memref<2x1x128xf32, #tpu.memory_space<vmem>>, %arg10: memref<128x256xf32, #tpu.memory_space<vmem>>, %arg11: memref<1x256xf32, #tpu.memory_space<vmem>>, %arg12: memref<1x256xf32, #tpu.memory_space<vmem>>, %arg13: memref<1x256xf32, #tpu.memory_space<vmem>>, %arg14: memref<1x256xf32, #tpu.memory_space<vmem>>, %arg15: memref<2x64x256xbf16, #tpu.memory_space<vmem>>, %arg16: memref<2x1x256xf32, #tpu.memory_space<vmem>>, %arg17: memref<2x1x64xf32, #tpu.memory_space<vmem>>) attributes {dimension_semantics = [#tpu.dimension_semantics<parallel>], iteration_bounds = array<i64: 1>, scalar_prefetch = 0 : i64, scratch_operands = 0 : i64, tpu.core_type = #tpu.core_type<tc>, window_params = [{transform_indices = @transform_0, window_bounds = array<i64: 2, 64, 64>}, {transform_indices = @transform_1, window_bounds = array<i64: 2, 1, 1>}, {pipeline_mode = #tpu.pipeline_mode<synchronous>, transform_indices = @transform_2, window_bounds = array<i64: 64, 256>}, {pipeline_mode = #tpu.pipeline_mode<synchronous>, transform_indices = @transform_3, window_bounds = array<i64: 1, 256>}, {pipeline_mode = #tpu.pipeline_mode<synchronous>, transform_indices = @transform_4, window_bounds = array<i64: 1, 256>}, {pipeline_mode = #tpu.pipeline_mode<synchronous>, transform_indices = @transform_5, window_bounds = array<i64: 1, 256>}, {pipeline_mode = #tpu.pipeline_mode<synchronous>, transform_indices = @transform_6, window_bounds = array<i64: 256, 32>}, {pipeline_mode = #tpu.pipeline_mode<synchronous>, transform_indices = @transform_7, window_bounds = array<i64: 32, 256>}, {transform_indices = @transform_8, window_bounds = array<i64: 2, 1, 128>}, {pipeline_mode = #tpu.pipeline_mode<synchronous>, transform_indices = @transform_9, window_bounds = array<i64: 128, 256>}, {pipeline_mode = #tpu.pipeline_mode<synchronous>, transform_indices = @transform_10, window_bounds = array<i64: 1, 256>}, {pipeline_mode = #tpu.pipeline_mode<synchronous>, transform_indices = @transform_11, window_bounds = array<i64: 1, 256>}, {pipeline_mode = #tpu.pipeline_mode<synchronous>, transform_indices = @transform_12, window_bounds = array<i64: 1, 256>}, {pipeline_mode = #tpu.pipeline_mode<synchronous>, transform_indices = @transform_13, window_bounds = array<i64: 1, 256>}, {transform_indices = @transform_14, window_bounds = array<i64: 2, 64, 256>}, {transform_indices = @transform_15, window_bounds = array<i64: 2, 1, 256>}, {transform_indices = @transform_16, window_bounds = array<i64: 2, 1, 64>}]} {
    %c0 = arith.constant 0 : index
    %c0_0 = arith.constant 0 : index
    %c0_1 = arith.constant 0 : index
    %0 = vector.load %arg2[%c0, %c0_0, %c0_1] : memref<2x1x1xf32, #tpu.memory_space<vmem>>, vector<2x1x1xf32>
    %c0_2 = arith.constant 0 : index
    %c0_3 = arith.constant 0 : index
    %c0_4 = arith.constant 0 : index
    %1 = vector.load %arg1[%c0_2, %c0_3, %c0_4] : memref<2x64x64xbf16, #tpu.memory_space<vmem>>, vector<2x64x64xbf16>
    %2 = arith.truncf %0 : vector<2x1x1xf32> to vector<2x1x1xbf16>
    %3 = vector.broadcast %2 : vector<2x1x1xbf16> to vector<2x64x64xbf16>
    %4 = arith.mulf %1, %3 : vector<2x64x64xbf16>
    %5 = vector.shape_cast %4 : vector<2x64x64xbf16> to vector<128x64xbf16>
    %c0_5 = arith.constant 0 : index
    %c0_6 = arith.constant 0 : index
    %6 = vector.load %arg3[%c0_5, %c0_6] : memref<64x256xbf16, #tpu.memory_space<vmem>>, vector<64x256xbf16>
    %cst = arith.constant dense<0.000000e+00> : vector<128x256xf32>
    %7 = tpu.matmul %5, %6, %cst {dimension_numbers = #tpu.dot_dimension_numbers<[1], [0], [0], [1], [0, 0, 1, 1], [], []>} : vector<128x64xbf16>, vector<64x256xbf16>, vector<128x256xf32> -> vector<128x256xf32>
    %c0_7 = arith.constant 0 : index
    %c0_8 = arith.constant 0 : index
    %8 = vector.load %arg4[%c0_7, %c0_8] : memref<1x256xf32, #tpu.memory_space<vmem>>, vector<1x256xf32>
    %9 = vector.broadcast %8 : vector<1x256xf32> to vector<128x256xf32>
    %10 = arith.addf %7, %9 : vector<128x256xf32>
    %11 = vector.shape_cast %10 : vector<128x256xf32> to vector<2x64x256xf32>
    %c0_9 = arith.constant 0 : index
    %c0_10 = arith.constant 0 : index
    %12 = vector.load %arg7[%c0_9, %c0_10] : memref<256x32xf32, #tpu.memory_space<vmem>>, vector<256x32xf32>
    %c0_11 = arith.constant 0 : index
    %c0_12 = arith.constant 0 : index
    %13 = vector.load %arg8[%c0_11, %c0_12] : memref<32x256xf32, #tpu.memory_space<vmem>>, vector<32x256xf32>
    %cst_13 = arith.constant dense<0.000000e+00> : vector<2x256xf32>
    %14 = vector.multi_reduction <add>, %11, %cst_13 [1] : vector<2x64x256xf32> to vector<2x256xf32>
    %15 = arith.mulf %11, %11 : vector<2x64x256xf32>
    %cst_14 = arith.constant dense<0.000000e+00> : vector<2x256xf32>
    %16 = vector.multi_reduction <add>, %15, %cst_14 [1] : vector<2x64x256xf32> to vector<2x256xf32>
    %cst_15 = arith.constant dense<0.000000e+00> : vector<2x32xf32>
    %17 = tpu.matmul %14, %12, %cst_15 {dimension_numbers = #tpu.dot_dimension_numbers<[1], [0], [0], [1], [0, 0, 1, 1], [], []>} : vector<2x256xf32>, vector<256x32xf32>, vector<2x32xf32> -> vector<2x32xf32>
    %cst_16 = arith.constant 0.001953125 : f32
    %18 = vector.broadcast %cst_16 : f32 to vector<2x32xf32>
    %19 = arith.mulf %17, %18 : vector<2x32xf32>
    %cst_17 = arith.constant dense<0.000000e+00> : vector<2x32xf32>
    %20 = tpu.matmul %16, %12, %cst_17 {dimension_numbers = #tpu.dot_dimension_numbers<[1], [0], [0], [1], [0, 0, 1, 1], [], []>} : vector<2x256xf32>, vector<256x32xf32>, vector<2x32xf32> -> vector<2x32xf32>
    %cst_18 = arith.constant 0.001953125 : f32
    %21 = vector.broadcast %cst_18 : f32 to vector<2x32xf32>
    %22 = arith.mulf %20, %21 : vector<2x32xf32>
    %23 = arith.mulf %19, %19 : vector<2x32xf32>
    %24 = arith.subf %22, %23 : vector<2x32xf32>
    %cst_19 = arith.constant 0.000000e+00 : f32
    %25 = vector.broadcast %cst_19 : f32 to vector<2x32xf32>
    %26 = arith.maximumf %24, %25 : vector<2x32xf32>
    %cst_20 = arith.constant 9.99999974E-6 : f32
    %27 = vector.broadcast %cst_20 : f32 to vector<2x32xf32>
    %28 = arith.addf %26, %27 : vector<2x32xf32>
    %29 = math.rsqrt %28 : vector<2x32xf32>
    %cst_21 = arith.constant dense<0.000000e+00> : vector<2x256xf32>
    %30 = tpu.matmul %19, %13, %cst_21 {dimension_numbers = #tpu.dot_dimension_numbers<[1], [0], [0], [1], [0, 0, 1, 1], [], []>} : vector<2x32xf32>, vector<32x256xf32>, vector<2x256xf32> -> vector<2x256xf32>
    %cst_22 = arith.constant dense<0.000000e+00> : vector<2x256xf32>
    %31 = tpu.matmul %29, %13, %cst_22 {dimension_numbers = #tpu.dot_dimension_numbers<[1], [0], [0], [1], [0, 0, 1, 1], [], []>} : vector<2x32xf32>, vector<32x256xf32>, vector<2x256xf32> -> vector<2x256xf32>
    %c0_23 = arith.constant 0 : index
    %c0_24 = arith.constant 0 : index
    %32 = vector.load %arg5[%c0_23, %c0_24] : memref<1x256xf32, #tpu.memory_space<vmem>>, vector<1x256xf32>
    %33 = vector.broadcast %32 : vector<1x256xf32> to vector<2x256xf32>
    %34 = arith.mulf %31, %33 : vector<2x256xf32>
    %c0_25 = arith.constant 0 : index
    %c0_26 = arith.constant 0 : index
    %35 = vector.load %arg6[%c0_25, %c0_26] : memref<1x256xf32, #tpu.memory_space<vmem>>, vector<1x256xf32>
    %36 = arith.mulf %30, %34 : vector<2x256xf32>
    %37 = vector.broadcast %35 : vector<1x256xf32> to vector<2x256xf32>
    %38 = arith.subf %37, %36 : vector<2x256xf32>
    %39 = vector.shape_cast %34 : vector<2x256xf32> to vector<2x1x256xf32>
    %40 = vector.broadcast %39 : vector<2x1x256xf32> to vector<2x64x256xf32>
    %41 = arith.mulf %11, %40 : vector<2x64x256xf32>
    %42 = vector.shape_cast %38 : vector<2x256xf32> to vector<2x1x256xf32>
    %43 = vector.broadcast %42 : vector<2x1x256xf32> to vector<2x64x256xf32>
    %44 = arith.addf %41, %43 : vector<2x64x256xf32>
    %45 = arith.truncf %44 : vector<2x64x256xf32> to vector<2x64x256xbf16>
    %c0_27 = arith.constant 0 : index
    %c0_28 = arith.constant 0 : index
    %c0_29 = arith.constant 0 : index
    %46 = vector.load %arg15[%c0_27, %c0_28, %c0_29] : memref<2x64x256xbf16, #tpu.memory_space<vmem>>, vector<2x64x256xbf16>
    tpu.vector_store %arg15[%c0_27, %c0_28, %c0_29], %45 {strides = array<i32>} : memref<2x64x256xbf16, #tpu.memory_space<vmem>>, vector<2x64x256xbf16>,
    %c0_30 = arith.constant 0 : index
    %c0_31 = arith.constant 0 : index
    %47 = vector.load %arg14[%c0_30, %c0_31] : memref<1x256xf32, #tpu.memory_space<vmem>>, vector<1x256xf32>
    %48 = vector.shape_cast %47 : vector<1x256xf32> to vector<1x1x256xf32>
    %49 = vector.broadcast %48 : vector<1x1x256xf32> to vector<2x64x256xf32>
    %50 = arith.mulf %44, %49 : vector<2x64x256xf32>
    %cst_32 = arith.constant dense<0.000000e+00> : vector<2x64xf32>
    %51 = vector.multi_reduction <add>, %50, %cst_32 [2] : vector<2x64x256xf32> to vector<2x64xf32>
    %52 = vector.shape_cast %51 : vector<2x64xf32> to vector<2x1x64xf32>
    %c0_33 = arith.constant 0 : index
    %c0_34 = arith.constant 0 : index
    %c0_35 = arith.constant 0 : index
    %53 = vector.load %arg17[%c0_33, %c0_34, %c0_35] : memref<2x1x64xf32, #tpu.memory_space<vmem>>, vector<2x1x64xf32>
    tpu.vector_store %arg17[%c0_33, %c0_34, %c0_35], %52 {strides = array<i32>} : memref<2x1x64xf32, #tpu.memory_space<vmem>>, vector<2x1x64xf32>,
    %c0_36 = arith.constant 0 : index
    %c0_37 = arith.constant 0 : index
    %c0_38 = arith.constant 0 : index
    %54 = vector.load %arg9[%c0_36, %c0_37, %c0_38] : memref<2x1x128xf32, #tpu.memory_space<vmem>>, vector<2x1x128xf32>
    %55 = vector.shape_cast %54 : vector<2x1x128xf32> to vector<2x128xf32>
    %c0_39 = arith.constant 0 : index
    %c0_40 = arith.constant 0 : index
    %56 = vector.load %arg10[%c0_39, %c0_40] : memref<128x256xf32, #tpu.memory_space<vmem>>, vector<128x256xf32>
    %cst_41 = arith.constant dense<0.000000e+00> : vector<2x256xf32>
    %57 = tpu.matmul %55, %56, %cst_41 {dimension_numbers = #tpu.dot_dimension_numbers<[1], [0], [0], [1], [0, 0, 1, 1], [], []>} : vector<2x128xf32>, vector<128x256xf32>, vector<2x256xf32> -> vector<2x256xf32>
    %c0_42 = arith.constant 0 : index
    %c0_43 = arith.constant 0 : index
    %58 = vector.load %arg11[%c0_42, %c0_43] : memref<1x256xf32, #tpu.memory_space<vmem>>, vector<1x256xf32>
    %59 = vector.broadcast %58 : vector<1x256xf32> to vector<2x256xf32>
    %60 = arith.addf %57, %59 : vector<2x256xf32>
    %cst_44 = arith.constant dense<0.000000e+00> : vector<2xf32>
    %61 = vector.multi_reduction <add>, %60, %cst_44 [1] : vector<2x256xf32> to vector<2xf32>
    %62 = vector.shape_cast %61 : vector<2xf32> to vector<2x1xf32>
    %cst_45 = arith.constant 2.560000e+02 : f32
    %63 = vector.broadcast %cst_45 : f32 to vector<2x1xf32>
    %64 = arith.divf %62, %63 : vector<2x1xf32>
    %65 = vector.broadcast %64 : vector<2x1xf32> to vector<2x256xf32>
    %66 = arith.subf %60, %65 : vector<2x256xf32>
    %67 = arith.mulf %66, %66 : vector<2x256xf32>
    %cst_46 = arith.constant dense<0.000000e+00> : vector<2xf32>
    %68 = vector.multi_reduction <add>, %67, %cst_46 [1] : vector<2x256xf32> to vector<2xf32>
    %69 = vector.shape_cast %68 : vector<2xf32> to vector<2x1xf32>
    %cst_47 = arith.constant 2.560000e+02 : f32
    %70 = vector.broadcast %cst_47 : f32 to vector<2x1xf32>
    %71 = arith.divf %69, %70 : vector<2x1xf32>
    %cst_48 = arith.constant 9.99999974E-6 : f32
    %72 = vector.broadcast %cst_48 : f32 to vector<2x1xf32>
    %73 = arith.addf %71, %72 : vector<2x1xf32>
    %74 = math.rsqrt %73 : vector<2x1xf32>
    %75 = vector.broadcast %74 : vector<2x1xf32> to vector<2x256xf32>
    %76 = arith.mulf %66, %75 : vector<2x256xf32>
    %c0_49 = arith.constant 0 : index
    %c0_50 = arith.constant 0 : index
    %77 = vector.load %arg12[%c0_49, %c0_50] : memref<1x256xf32, #tpu.memory_space<vmem>>, vector<1x256xf32>
    %78 = vector.broadcast %77 : vector<1x256xf32> to vector<2x256xf32>
    %79 = arith.mulf %76, %78 : vector<2x256xf32>
    %c0_51 = arith.constant 0 : index
    %c0_52 = arith.constant 0 : index
    %80 = vector.load %arg13[%c0_51, %c0_52] : memref<1x256xf32, #tpu.memory_space<vmem>>, vector<1x256xf32>
    %81 = vector.broadcast %80 : vector<1x256xf32> to vector<2x256xf32>
    %82 = arith.addf %79, %81 : vector<2x256xf32>
    %83 = vector.shape_cast %0 : vector<2x1x1xf32> to vector<2x1xf32>
    %84 = vector.broadcast %83 : vector<2x1xf32> to vector<2x256xf32>
    %85 = arith.mulf %82, %84 : vector<2x256xf32>
    %86 = vector.shape_cast %85 : vector<2x256xf32> to vector<2x1x256xf32>
    %c0_53 = arith.constant 0 : index
    %c0_54 = arith.constant 0 : index
    %c0_55 = arith.constant 0 : index
    %87 = vector.load %arg16[%c0_53, %c0_54, %c0_55] : memref<2x1x256xf32, #tpu.memory_space<vmem>>, vector<2x1x256xf32>
    tpu.vector_store %arg16[%c0_53, %c0_54, %c0_55], %86 {strides = array<i32>} : memref<2x1x256xf32, #tpu.memory_space<vmem>>, vector<2x1x256xf32>,
    return
  }
  func.func @transform_0(%arg0: i32) -> (i32, i32, i32) {
    %c0_i32 = arith.constant 0 : i32
    %c0_i32_0 = arith.constant 0 : i32
    %c0_i32_1 = arith.constant 0 : i32
    return %arg0, %c0_i32, %c0_i32_0 : i32, i32, i32
  }
  func.func @transform_1(%arg0: i32) -> (i32, i32, i32) {
    %c0_i32 = arith.constant 0 : i32
    %c0_i32_0 = arith.constant 0 : i32
    %c0_i32_1 = arith.constant 0 : i32
    return %arg0, %c0_i32, %c0_i32_0 : i32, i32, i32
  }
  func.func @transform_2(%arg0: i32) -> (i32, i32) {
    %c0_i32 = arith.constant 0 : i32
    %c0_i32_0 = arith.constant 0 : i32
    %c0_i32_1 = arith.constant 0 : i32
    return %c0_i32, %c0_i32_0 : i32, i32
  }
  func.func @transform_3(%arg0: i32) -> (i32, i32) {
    %c0_i32 = arith.constant 0 : i32
    %c0_i32_0 = arith.constant 0 : i32
    %c0_i32_1 = arith.constant 0 : i32
    return %c0_i32, %c0_i32_0 : i32, i32
  }
  func.func @transform_4(%arg0: i32) -> (i32, i32) {
    %c0_i32 = arith.constant 0 : i32
    %c0_i32_0 = arith.constant 0 : i32
    %c0_i32_1 = arith.constant 0 : i32
    return %c0_i32, %c0_i32_0 : i32, i32
  }
  func.func @transform_5(%arg0: i32) -> (i32, i32) {
    %c0_i32 = arith.constant 0 : i32
    %c0_i32_0 = arith.constant 0 : i32
    %c0_i32_1 = arith.constant 0 : i32
    return %c0_i32, %c0_i32_0 : i32, i32
  }
  func.func @transform_6(%arg0: i32) -> (i32, i32) {
    %c0_i32 = arith.constant 0 : i32
    %c0_i32_0 = arith.constant 0 : i32
    %c0_i32_1 = arith.constant 0 : i32
    return %c0_i32, %c0_i32_0 : i32, i32
  }
  func.func @transform_7(%arg0: i32) -> (i32, i32) {
    %c0_i32 = arith.constant 0 : i32
    %c0_i32_0 = arith.constant 0 : i32
    %c0_i32_1 = arith.constant 0 : i32
    return %c0_i32, %c0_i32_0 : i32, i32
  }
  func.func @transform_8(%arg0: i32) -> (i32, i32, i32) {
    %c0_i32 = arith.constant 0 : i32
    %c0_i32_0 = arith.constant 0 : i32
    %c0_i32_1 = arith.constant 0 : i32
    return %arg0, %c0_i32, %c0_i32_0 : i32, i32, i32
  }
  func.func @transform_9(%arg0: i32) -> (i32, i32) {
    %c0_i32 = arith.constant 0 : i32
    %c0_i32_0 = arith.constant 0 : i32
    %c0_i32_1 = arith.constant 0 : i32
    return %c0_i32, %c0_i32_0 : i32, i32
  }
  func.func @transform_10(%arg0: i32) -> (i32, i32) {
    %c0_i32 = arith.constant 0 : i32
    %c0_i32_0 = arith.constant 0 : i32
    %c0_i32_1 = arith.constant 0 : i32
    return %c0_i32, %c0_i32_0 : i32, i32
  }
  func.func @transform_11(%arg0: i32) -> (i32, i32) {
    %c0_i32 = arith.constant 0 : i32
    %c0_i32_0 = arith.constant 0 : i32
    %c0_i32_1 = arith.constant 0 : i32
    return %c0_i32, %c0_i32_0 : i32, i32
  }
  func.func @transform_12(%arg0: i32) -> (i32, i32) {
    %c0_i32 = arith.constant 0 : i32
    %c0_i32_0 = arith.constant 0 : i32
    %c0_i32_1 = arith.constant 0 : i32
    return %c0_i32, %c0_i32_0 : i32, i32
  }
  func.func @transform_13(%arg0: i32) -> (i32, i32) {
    %c0_i32 = arith.constant 0 : i32
    %c0_i32_0 = arith.constant 0 : i32
    %c0_i32_1 = arith.constant 0 : i32
    return %c0_i32, %c0_i32_0 : i32, i32
  }
  func.func @transform_14(%arg0: i32) -> (i32, i32, i32) {
    %c0_i32 = arith.constant 0 : i32
    %c0_i32_0 = arith.constant 0 : i32
    %c0_i32_1 = arith.constant 0 : i32
    return %arg0, %c0_i32, %c0_i32_0 : i32, i32, i32
  }
  func.func @transform_15(%arg0: i32) -> (i32, i32, i32) {
    %c0_i32 = arith.constant 0 : i32
    %c0_i32_0 = arith.constant 0 : i32
    %c0_i32_1 = arith.constant 0 : i32
    return %arg0, %c0_i32, %c0_i32_0 : i32, i32, i32
  }
  func.func @transform_16(%arg0: i32) -> (i32, i32, i32) {
    %c0_i32 = arith.constant 0 : i32
    %c0_i32_0 = arith.constant 0 : i32
    %c0_i32_1 = arith.constant 0 : i32
    return %arg0, %c0_i32, %c0_i32_0 : i32, i32, i32
  }
}

</mosaic_0001>

<bundles_post_ra>
// kernel: tpu_custom_call.1
= control target key start
LH: loop header
LB: loop body
LE: loop exit
PB: predicated region body
PF: predicated region fallthrough
CT: control target
= control target key end

     0   :  { %s2869_s0 = inlined_call_operand.vmem [shape: bf16[2,64,64], index: 0, kind: input, shape index: {}]   ;;  %s2870_s1 = inlined_call_operand.vmem [shape: f32[2,1,1], index: 1, kind: input, shape index: {}]   ;;  %s2871_s2 = inlined_call_operand.hbm [shape: bf16[64,256], index: 2, kind: input, shape index: {}]   ;;  %s2872_s3 = inlined_call_operand.vmem [shape: f32[1,256], index: 3, kind: input, shape index: {}]   ;;  %s2873_s4 = inlined_call_operand.vmem [shape: f32[1,256], index: 4, kind: input, shape index: {}]   ;;  %s2874_s5 = inlined_call_operand.vmem [shape: f32[1,256], index: 5, kind: input, shape index: {}]   ;;  %s2875_s6 = inlined_call_operand.vmem [shape: f32[256,32], index: 6, kind: input, shape index: {}]   ;;  %s2876_s7 = inlined_call_operand.hbm [shape: f32[32,256], index: 7, kind: input, shape index: {}]   ;;  %s2877_s8 = inlined_call_operand.vmem [shape: f32[2,1,128], index: 8, kind: input, shape index: {}]   ;;  %s2878_s9 = inlined_call_operand.vmem [shape: f32[128,256], index: 9, kind: input, shape index: {}]   ;;  %s2879_s10 = inlined_call_operand.vmem [shape: f32[1,256], index: 10, kind: input, shape index: {}]   ;;  %s2880_s11 = inlined_call_operand.vmem [shape: f32[1,256], index: 11, kind: input, shape index: {}]   ;;  %s2881_s12 = inlined_call_operand.vmem [shape: f32[1,256], index: 12, kind: input, shape index: {}]   ;;  %s2882_s13 = inlined_call_operand.vmem [shape: f32[1,256], index: 13, kind: input, shape index: {}]   ;;  %s2883_s14 = inlined_call_operand.hbm [shape: bf16[2,64,256], index: 14, kind: output, shape index: {0}]   ;;  %s2884_s15 = inlined_call_operand.hbm [shape: f32[2,1,256], index: 15, kind: output, shape index: {1}]   ;;  %s2885_s16 = inlined_call_operand.hbm [shape: f32[2,1,64], index: 16, kind: output, shape index: {2}]  }
   0x1   :  { %2895 = sst [smem:[#allocation21_spill]] %s2869_s0 }
   0x2   :  { %22 = vsyncpa [#allocation3], 0 }
   0x3   :  { %23 = vsyncpa [#allocation6], 0 }
   0x4   :  { %24 = vsyncpa [#allocation4], 0 }
   0x5   :  { %25 = vsyncpa [#allocation9], 0  ;;  %s1944_s21 = smov [#allocation2]  }
   0x6   :  { %s35_s22 = sshll.u32 %s1944_s21, 4  ;;  %s36_s22 = int_to_ptr.vmem [resolvable:$true] %s35_s22 }
   0x7   :  { %s1844_s23 = scalar_lea.vmem %s36_s22, 1024  ;;  %p1849_p1 = scmp.lt.s32.totalorder %s36_s22, %s36_s22 }
   0x8   :  { %p1845_p0 = scmp.ne.s32.totalorder %s36_s22, %s1844_s23  ;;  %p1850_p2 = scmp.lt.s32.totalorder %s1844_s23, %s1844_s23 }
   0xa   :  { %p1851_p3 = por %p1850_p2, %p1849_p1 }
   0xc   :  { %p1852_p4 = pnand %p1851_p3, %p1845_p0 }
   0xe   :  { %1855 = shalt.err (!%p1852_p4)
}
   0xf   :  { %s1945_s24 = smov 128   ;;  %s1946_s25 = smov 8  }
  0x10   :  { %41 = dma.hbm_to_vmem [thread:$0]  %s2871_s2, 1024, %s36_s22, [#allocation3], %s1945_s24, %s1945_s24, %s1946_s25  }
  0x11   :  { %s1947_s28 = smov [#allocation5]  }
  0x12   :  { %s55_s29 = sshll.u32 %s1947_s28, 4  ;;  %s56_s29 = int_to_ptr.vmem [resolvable:$true] %s55_s29 }
  0x13   :  { %s1864_s30 = scalar_lea.vmem %s56_s29, 1024  ;;  %p1869_p6 = scmp.lt.s32.totalorder %s56_s29, %s56_s29 }
  0x14   :  { %p1865_p5 = scmp.ne.s32.totalorder %s56_s29, %s1864_s30  ;;  %p1870_p7 = scmp.lt.s32.totalorder %s1864_s30, %s1864_s30 }
  0x16   :  { %p1871_p8 = por %p1870_p7, %p1869_p6 }
  0x18   :  { %p1872_p9 = pnand %p1871_p8, %p1865_p5 }
  0x1a   :  { %1875 = shalt.err (!%p1872_p9)
}
  0x1b   :  { %s1948_s0 = smov 256   ;;  %s1949_s17 = smov 16  }
  0x1c   :  { %61 = dma.hbm_to_vmem [thread:$0]  %s2876_s7, 1024, %s56_s29, [#allocation6], %s1948_s0, %s1948_s0, %s1949_s17  }
  0x1d   :  { %1936 = dma.done.wait [#allocation3], 1024  }
  0x1e   :  { %1937 = vsyncadd [#allocation3], 4294966272 }
  0x1f   :  { %1938 = dma.done.wait [#allocation6], 1024  }
  0x20   :  { %1939 = vsyncadd [#allocation6], 4294966272  ;;  %v1950_v0 = vmov 0   ;;  %v81_v1 = vld [vmem:[%s2870_s1] sm:$0x1]  ;;  %s2896_s26 = sld [smem:[#allocation21_spill]] }
  0x21   :  { %284 = vmatprep.mubr.bf16.mxu0 %v1950_v0  ;;  %1818 = vset.pattern.permute.xlu1 %v1950_v0  ;;  %v82_v2 = vld [vmem:[%s2870_s1 + $0x1] sm:$0x1]  ;;  %v99_v3 = vpack.c.bf16 %v81_v1, %v81_v1  ;;  %v1820_v5 = vld [vmem:[#allocation2 + $0x34] ss:$8 sps:$4 sm:$0xff]   ;;  %v1822_v6 = vld [vmem:[#allocation2 + $0x30] ss:$8 sps:$4 sm:$0xff]  }
  0x22   :  { %1819 = vset.pattern.permute.xlu0 %v1950_v0  ;;  %v100_v4 = vpack.c.bf16 %v82_v2, %v82_v2  ;;  %1544 = vperm.xlu1 %1818, %v81_v1   ;;  %v1823_v7 = vld [vmem:[#allocation2 + $0x24] ss:$8 sps:$4 sm:$0xff]   ;;  %v1825_v8 = vld [vmem:[#allocation2 + $0x20] ss:$8 sps:$4 sm:$0xff]   ;;  %v1826_v9 = vld [vmem:[#allocation2 + $0x14] ss:$8 sps:$4 sm:$0xff]  }
  0x23   :  { %1799 = vpush %v99_v3  ;;  %260 = vmatprep.subr.bf16.mxu0 %v1820_v5  ;;  %v1828_v10 = vld [vmem:[#allocation2 + $0x10] ss:$8 sps:$4 sm:$0xff]   ;;  %v1829_v11 = vld [vmem:[#allocation2 + $0x4] ss:$8 sps:$4 sm:$0xff]   ;;  %v1831_v12 = vld [vmem:[#allocation2] ss:$8 sps:$4 sm:$0xff]  }
  0x24   :  { %1801 = vpush %v100_v4  ;;  %261 = vmatpush1.bf16.msra.mxu0 %v1822_v6  ;;  %vm227_vm0 = vcmask 523264   ;;  %v396_v57 = vld [vmem:[%s2875_s6 + $0xf8] sm:$0xff]  ;;  %v395_v59 = vld [vmem:[%s2875_s6 + $0xf0] sm:$0xff]  ;;  %v394_v61 = vld [vmem:[%s2875_s6 + $0xe8] sm:$0xff]  ;;  %vm545_vm1 = vcmask 1041409   ;;  %vm705_vm2 = vcmask 261120  }
  0x25   :  { %262 = vmatprep.subr.bf16.mxu0 %v1823_v7  ;;  %v380_v58 = vld [vmem:[%s2875_s6 + $0x78] sm:$0xff]  ;;  %1764 = vmatprep.subr.mxu1 %v396_v57  ;;  %v379_v60 = vld [vmem:[%s2875_s6 + $0x70] sm:$0xff]  ;;  %v378_v62 = vld [vmem:[%s2875_s6 + $0x68] sm:$0xff]  ;;  %vm1492_vm3 = vcmask 1041408  }
  0x26   :  { %1553 = vperm.xlu1 %1818, %v82_v2   ;;  %v83_v14 = vld [vmem:[%s2896_s26] sm:$0xf]  ;;  %v84_v15 = vld [vmem:[%s2896_s26 + $0x4] sm:$0xf]  ;;  %v85_v20 = vld [vmem:[%s2896_s26 + $0x8] sm:$0xf]  ;;  %1765 = vmatpush3.msra.mxu1 %v380_v58 }
  0x27   :  { %v86_v21 = vld [vmem:[%s2896_s26 + $0xc] sm:$0xf]  ;;  %v87_v25 = vld [vmem:[%s2896_s26 + $0x10] sm:$0xf]  ;;  %v88_v26 = vld [vmem:[%s2896_s26 + $0x14] sm:$0xf]  ;;  %1766 = vmatprep.subr.mxu1 %v395_v59 }
  0x28   :  { %263 = vmatpush1.bf16.msra.mxu0 %v1825_v8  ;;  %v89_v30 = vld [vmem:[%s2896_s26 + $0x18] sm:$0xf]  ;;  %v90_v31 = vld [vmem:[%s2896_s26 + $0x1c] sm:$0xf]  ;;  %v91_v36 = vld [vmem:[%s2896_s26 + $0x20] sm:$0xf]  ;;  %1767 = vmatpush3.msra.mxu1 %v379_v60 }
  0x29   :  { %264 = vmatprep.subr.bf16.mxu0 %v1826_v9  ;;  %v92_v37 = vld [vmem:[%s2896_s26 + $0x24] sm:$0xf]  ;;  %v93_v42 = vld [vmem:[%s2896_s26 + $0x28] sm:$0xf]  ;;  %v94_v43 = vld [vmem:[%s2896_s26 + $0x2c] sm:$0xf]  ;;  %1768 = vmatprep.subr.mxu1 %v394_v61 }
  0x2a   :  { %v95_v47 = vld [vmem:[%s2896_s26 + $0x30] sm:$0xf]  ;;  %v96_v48 = vld [vmem:[%s2896_s26 + $0x34] sm:$0xf]  ;;  %v97_v52 = vld [vmem:[%s2896_s26 + $0x38] sm:$0xf]  ;;  %1769 = vmatpush3.msra.mxu1 %v378_v62 }
  0x2b   :  { %v98_v53 = vld [vmem:[%s2896_s26 + $0x3c] sm:$0xf]  ;;  %v393_v63 = vld [vmem:[%s2875_s6 + $0xe0] sm:$0xff]  ;;  %v391_v3 = vld [vmem:[%s2875_s6 + $0xd0] sm:$0xff] }
  0x2c   :  { %265 = vmatpush1.bf16.msra.mxu0 %v1828_v10  ;;  %v392_v1 = vld [vmem:[%s2875_s6 + $0xd8] sm:$0xff]  ;;  %1770 = vmatprep.subr.mxu1 %v393_v63  ;;  %v375_v4 = vld [vmem:[%s2875_s6 + $0x50] sm:$0xff]  ;;  %v390_v5 = vld [vmem:[%s2875_s6 + $0xc8] sm:$0xff] }
  0x2d   :  { %266 = vmatprep.subr.bf16.mxu0 %v1829_v11  ;;  %v376_v2 = vld [vmem:[%s2875_s6 + $0x58] sm:$0xff]  ;;  %v374_v6 = vld [vmem:[%s2875_s6 + $0x48] sm:$0xff]  ;;  %v389_v7 = vld [vmem:[%s2875_s6 + $0xc0] sm:$0xff] }
  0x2e   :  { %v373_v8 = vld [vmem:[%s2875_s6 + $0x40] sm:$0xff]  ;;  %v388_v9 = vld [vmem:[%s2875_s6 + $0xb8] sm:$0xff]  ;;  %v387_v11 = vld [vmem:[%s2875_s6 + $0xb0] sm:$0xff] }
  0x2f   :  { %v372_v10 = vld [vmem:[%s2875_s6 + $0x38] sm:$0xff] }
  0x30   :  { %267 = vmatpush1.bf16.msra.mxu0 %v1831_v12  ;;  %v371_v12 = vld [vmem:[%s2875_s6 + $0x30] sm:$0xff] }
  0x31   :  { %1729 = vmatprep.subr.mxu0 %v396_v57 }
  0x54   :  { %s1800_s1 = spop %1799 }
  0x55   :  { %v103_v13 = vstv %s1800_s1  ;;  %s1802_s22 = spop %1801 }
  0x56   :  { %v104_v16 = vpack.i.b16 %v103_v13, %v103_v13  ;;  %v108_v32 = vstv %s1802_s22  ;;  %v386_v13 = vld [vmem:[%s2875_s6 + $0xa8] sm:$0xff] }
  0x57   :  { %v109_v35 = vpack.i.b16 %v108_v32, %v108_v32 }
  0x58   :  { %v111_v17 = vmul.bf16 %v104_v16, %v83_v14  ;;  %v112_v18 = vmul.bf16 %v104_v16, %v84_v15  ;;  %v113_v22 = vmul.bf16 %v104_v16, %v85_v20  ;;  %v114_v23 = vmul.bf16 %v104_v16, %v86_v21  ;;  %v370_v14 = vld [vmem:[%s2875_s6 + $0x28] sm:$0xff]  ;;  %v385_v15 = vld [vmem:[%s2875_s6 + $0xa0] sm:$0xff]  ;;  %v367_v20 = vld [vmem:[%s2875_s6 + $0x10] sm:$0xff] }
  0x59   :  { %v115_v27 = vmul.bf16 %v104_v16, %v87_v25  ;;  %v116_v28 = vmul.bf16 %v104_v16, %v88_v26  ;;  %v117_v33 = vmul.bf16 %v104_v16, %v89_v30  ;;  %v118_v34 = vmul.bf16 %v104_v16, %v90_v31  ;;  %v369_v16 = vld [vmem:[%s2875_s6 + $0x20] sm:$0xff]  ;;  %v382_v21 = vld [vmem:[%s2875_s6 + $0x88] sm:$0xff]  ;;  %v2222_v25 = vld [vmem:[#allocation5 + $0x38] sm:$0xff] }
  0x5a   :  { %v1671_v19 = vcombine.low %v111_v17, %v112_v18  ;;  %v1672_v24 = vcombine.low %v113_v22, %v114_v23  ;;  %v119_v39 = vmul.bf16 %v109_v35, %v91_v36  ;;  %v120_v40 = vmul.bf16 %v109_v35, %v92_v37  ;;  %v384_v17 = vld [vmem:[%s2875_s6 + $0x98] sm:$0xff]  ;;  %v366_v22 = vld [vmem:[%s2875_s6 + $0x8] sm:$0xff]  ;;  %v381_v23 = vld [vmem:[%s2875_s6 + $0x80] sm:$0xff] }
  0x5b   :  { %v1673_v29 = vcombine.low %v115_v27, %v116_v28  ;;  %v1674_v38 = vcombine.low %v117_v33, %v118_v34  ;;  %v121_v44 = vmul.bf16 %v109_v35, %v93_v42  ;;  %v122_v45 = vmul.bf16 %v109_v35, %v94_v43  ;;  %v368_v18 = vld [vmem:[%s2875_s6 + $0x18] sm:$0xff] }
  0x5c   :  { %1687 = vmatmul.mubr.msk.bf16.vlgmr.msra.gmra.mxu0 %vm227_vm0, %v1671_v19  ;;  %v1675_v41 = vcombine.low %v119_v39, %v120_v40  ;;  %v123_v49 = vmul.bf16 %v109_v35, %v95_v47  ;;  %v124_v50 = vmul.bf16 %v109_v35, %v96_v48  ;;  %v125_v54 = vmul.bf16 %v109_v35, %v97_v52  ;;  %v383_v19 = vld [vmem:[%s2875_s6 + $0x90] sm:$0xff] }
  0x5d   :  { %294 = vmatprep.mubr.bf16.mxu0 %v1950_v0  ;;  %v1676_v46 = vcombine.low %v121_v44, %v122_v45  ;;  %v126_v55 = vmul.bf16 %v109_v35, %v98_v53  ;;  %1730 = vmatpush3.msra.mxu0 %v380_v58  ;;  %v2887_v34 = vlaneseq }
  0x5e   :  { %v1677_v51 = vcombine.low %v123_v49, %v124_v50  ;;  %1731 = vmatprep.subr.mxu0 %v395_v59 }
  0x5f   :  { %v1678_v56 = vcombine.low %v125_v54, %v126_v55  ;;  %1732 = vmatpush3.msra.mxu0 %v379_v60  ;;  %v2226_v37 = vshrl.u32 %v2887_v34, 7 }
  0x60   :  { %1733 = vmatprep.subr.mxu0 %v394_v61 }
  0x61   :  { %1734 = vmatpush3.msra.mxu0 %v378_v62  ;;  %v2229_v40 = vsub.s32 0, %v2226_v37  ;;  %v2235_v42 = vsub.s32 1, %v2226_v37 }
  0x62   :  { %1735 = vmatprep.subr.mxu0 %v393_v63 }
  0x64   :  { %1688 = vmatmul.mubr.msk.bf16.gmra.mxu0 %vm227_vm0, %v1672_v24  ;;  %v365_v24 = vld [vmem:[%s2875_s6] sm:$0xff] }
  0x65   :  { %304 = vmatprep.mubr.bf16.mxu0 %v1950_v0 }
  0x6c   :  { %1689 = vmatmul.mubr.msk.bf16.gmra.mxu0 %vm227_vm0, %v1673_v29 }
  0x6d   :  { %314 = vmatprep.mubr.bf16.mxu0 %v1950_v0 }
  0x74   :  { %1690 = vmatmul.mubr.msk.bf16.gmra.mxu0 %vm227_vm0, %v1674_v38 }
  0x75   :  { %324 = vmatprep.mubr.bf16.mxu0 %v1950_v0 }
  0x7c   :  { %1691 = vmatmul.mubr.msk.bf16.gmra.mxu0 %vm227_vm0, %v1675_v41  ;;  %v135_v41 = vld [vmem:[%s2872_s3] sm:$0x3] }
  0x7d   :  { %334 = vmatprep.mubr.bf16.mxu0 %v1950_v0  ;;  %v2238_v45 = vrot.slane %v135_v41, %v2229_v40 }
  0x84   :  { %1692 = vmatmul.mubr.msk.bf16.gmra.mxu0 %vm227_vm0, %v1676_v46  ;;  %v2241_v46 = vrot.slane %v135_v41, %v2235_v42 }
  0x85   :  { %344 = vmatprep.mubr.bf16.mxu0 %v1950_v0 }
  0x8c   :  { %1693 = vmatmul.mubr.msk.bf16.gmra.mxu0 %vm227_vm0, %v1677_v51 }
  0x8d   :  { %354 = vmatprep.mubr.bf16.mxu0 %v1950_v0  ;;  %v377_v0 = vld [vmem:[%s2875_s6 + $0x60] sm:$0xff] }
  0x8e   :  { %1736 = vmatpush3.msra.mxu0 %v377_v0  ;;  %1771 = vmatpush3.msra.mxu1 %v377_v0 }
  0x8f   :  { %1737 = vmatprep.subr.mxu0 %v392_v1  ;;  %1772 = vmatprep.subr.mxu1 %v392_v1 }
  0x90   :  { %1738 = vmatpush3.msra.mxu0 %v376_v2  ;;  %1773 = vmatpush3.msra.mxu1 %v376_v2 }
  0x91   :  { %1739 = vmatprep.subr.mxu0 %v391_v3  ;;  %1774 = vmatprep.subr.mxu1 %v391_v3 }
  0x92   :  { %1740 = vmatpush3.msra.mxu0 %v375_v4  ;;  %1775 = vmatpush3.msra.mxu1 %v375_v4 }
  0x93   :  { %1741 = vmatprep.subr.mxu0 %v390_v5  ;;  %1776 = vmatprep.subr.mxu1 %v390_v5 }
  0x94   :  { %1694 = vmatmul.mubr.msk.bf16.gmra.mxu0 %vm227_vm0, %v1678_v56  ;;  %1777 = vmatpush3.msra.mxu1 %v374_v6 }
  0x95   :  { %1742 = vmatpush3.msra.mxu0 %v374_v6  ;;  %1778 = vmatprep.subr.mxu1 %v389_v7 }
  0x96   :  { %1743 = vmatprep.subr.mxu0 %v389_v7  ;;  %1779 = vmatpush3.msra.mxu1 %v373_v8 }
  0x97   :  { %1744 = vmatpush3.msra.mxu0 %v373_v8  ;;  %1780 = vmatprep.subr.mxu1 %v388_v9 }
  0x98   :  { %1745 = vmatprep.subr.mxu0 %v388_v9  ;;  %1781 = vmatpush3.msra.mxu1 %v372_v10 }
  0x99   :  { %1746 = vmatpush3.msra.mxu0 %v372_v10  ;;  %1782 = vmatprep.subr.mxu1 %v387_v11 }
  0x9a   :  { %1747 = vmatprep.subr.mxu0 %v387_v11  ;;  %1783 = vmatpush3.msra.mxu1 %v371_v12 }
  0x9b   :  { %1748 = vmatpush3.msra.mxu0 %v371_v12  ;;  %1784 = vmatprep.subr.mxu1 %v386_v13 }
  0x9c   :  { %1749 = vmatprep.subr.mxu0 %v386_v13  ;;  %1785 = vmatpush3.msra.mxu1 %v370_v14 }
  0x9d   :  { %1750 = vmatpush3.msra.mxu0 %v370_v14  ;;  %1786 = vmatprep.subr.mxu1 %v385_v15 }
  0x9e   :  { %1751 = vmatprep.subr.mxu0 %v385_v15  ;;  %1787 = vmatpush3.msra.mxu1 %v369_v16 }
  0x9f   :  { %1752 = vmatpush3.msra.mxu0 %v369_v16  ;;  %1788 = vmatprep.subr.mxu1 %v384_v17 }
  0xa0   :  { %1753 = vmatprep.subr.mxu0 %v384_v17  ;;  %1789 = vmatpush3.msra.mxu1 %v368_v18 }
  0xa1   :  { %1754 = vmatpush3.msra.mxu0 %v368_v18  ;;  %1790 = vmatprep.subr.mxu1 %v383_v19 }
  0xa2   :  { %1755 = vmatprep.subr.mxu0 %v383_v19  ;;  %1791 = vmatpush3.msra.mxu1 %v367_v20 }
  0xa3   :  { %1756 = vmatpush3.msra.mxu0 %v367_v20  ;;  %1792 = vmatprep.subr.mxu1 %v382_v21 }
  0xa4   :  { %1757 = vmatprep.subr.mxu0 %v382_v21  ;;  %1793 = vmatpush3.msra.mxu1 %v366_v22 }
  0xa5   :  { %1758 = vmatpush3.msra.mxu0 %v366_v22  ;;  %1794 = vmatprep.subr.mxu1 %v381_v23 }
  0xa6   :  { %1759 = vmatprep.subr.mxu0 %v381_v23  ;;  %1795 = vmatpush3.msra.mxu1 %v365_v24 }
  0xa7   :  { %1760 = vmatpush3.msra.mxu0 %v365_v24  ;;  %733 = vmatprep.subr.mxu1 %v2222_v25 }
 0x11c   :  { %v286_v26 = vpop.f32.mrf.mxu0 }
 0x11d   :  { %v2250_v51 = vadd.f32 %v286_v26, %v2238_v45 }
 0x11e   :  { %v288_v27 = vpop.f32.mrf.mxu0 }
 0x11f   :  { %v2256_v53 = vadd.f32 %v288_v27, %v2241_v46  ;;  %v457_v61 = vmul.f32 %v2250_v51, %v2250_v51 }
 0x120   :  { %v290_v28 = vpop.f32.mrf.mxu0 }
 0x121   :  { %v2244_v48 = vadd.f32 %v290_v28, %v2238_v45  ;;  %v458_v0 = vmul.f32 %v2256_v53, %v2256_v53 }
 0x122   :  { %v292_v29 = vpop.f32.mrf.mxu0 }
 0x123   :  { %v2247_v49 = vadd.f32 %v292_v29, %v2241_v46  ;;  %v459_v56 = vmul.f32 %v2244_v48, %v2244_v48  ;;  %v405_v1 = vadd.f32 %v2244_v48, %v2250_v51 }
 0x124   :  { %v296_v30 = vpop.f32.mrf.mxu0 }
 0x125   :  { %v2253_v52 = vadd.f32 %v296_v30, %v2238_v45  ;;  %v460_v58 = vmul.f32 %v2247_v49, %v2247_v49  ;;  %v489_v5 = vadd.f32 %v459_v56, %v457_v61  ;;  %v418_v6 = vadd.f32 %v2247_v49, %v2256_v53 }
 0x126   :  { %v298_v31 = vpop.f32.mrf.mxu0 }
 0x127   :  { %v2259_v54 = vadd.f32 %v298_v31, %v2241_v46  ;;  %v461_v62 = vmul.f32 %v2253_v52, %v2253_v52  ;;  %v502_v9 = vadd.f32 %v460_v58, %v458_v0  ;;  %v406_v10 = vadd.f32 %v405_v1, %v2253_v52 }
 0x128   :  { %v300_v32 = vpop.f32.mrf.mxu0 }
 0x129   :  { %v2264_v57 = vadd.f32 %v300_v32, %v2238_v45  ;;  %v462_v2 = vmul.f32 %v2259_v54, %v2259_v54  ;;  %v490_v14 = vadd.f32 %v489_v5, %v461_v62  ;;  %v419_v17 = vadd.f32 %v418_v6, %v2259_v54 }
 0x12a   :  { %v302_v33 = vpop.f32.mrf.mxu0 }
 0x12b   :  { %v2269_v59 = vadd.f32 %v302_v33, %v2241_v46  ;;  %v463_v7 = vmul.f32 %v2264_v57, %v2264_v57  ;;  %v503_v18 = vadd.f32 %v502_v9, %v462_v2  ;;  %v407_v19 = vadd.f32 %v406_v10, %v2264_v57 }
 0x12c   :  { %v306_v35 = vpop.f32.mrf.mxu0 }
 0x12d   :  { %v2276_v63 = vadd.f32 %v306_v35, %v2238_v45  ;;  %v464_v11 = vmul.f32 %v2269_v59, %v2269_v59  ;;  %v491_v22 = vadd.f32 %v490_v14, %v463_v7  ;;  %v420_v26 = vadd.f32 %v419_v17, %v2269_v59 }
 0x12e   :  { %v308_v36 = vpop.f32.mrf.mxu0 }
 0x12f   :  { %v2285_v3 = vadd.f32 %v308_v36, %v2241_v46  ;;  %v465_v15 = vmul.f32 %v2276_v63, %v2276_v63  ;;  %v504_v27 = vadd.f32 %v503_v18, %v464_v11  ;;  %v408_v28 = vadd.f32 %v407_v19, %v2276_v63 }
 0x130   :  { %v310_v38 = vpop.f32.mrf.mxu0 }
 0x131   :  { %v2292_v8 = vadd.f32 %v310_v38, %v2238_v45  ;;  %v466_v20 = vmul.f32 %v2285_v3, %v2285_v3  ;;  %v492_v31 = vadd.f32 %v491_v22, %v465_v15  ;;  %v421_v35 = vadd.f32 %v420_v26, %v2285_v3 }
 0x132   :  { %v312_v39 = vpop.f32.mrf.mxu0 }
 0x133   :  { %2897 = vst [vmem:[#allocation15_spill] sm:$0xff] %v2292_v8  ;;  %v2298_v12 = vadd.f32 %v312_v39, %v2241_v46  ;;  %v467_v23 = vmul.f32 %v2292_v8, %v2292_v8  ;;  %v505_v36 = vadd.f32 %v504_v27, %v466_v20  ;;  %v409_v38 = vadd.f32 %v408_v28, %v2292_v8 }
 0x134   :  { %v316_v43 = vpop.f32.mrf.mxu0 }
 0x135   :  { %2898 = vst [vmem:[#allocation16_spill] sm:$0xff] %v2298_v12  ;;  %v2303_v16 = vadd.f32 %v316_v43, %v2238_v45  ;;  %v468_v29 = vmul.f32 %v2298_v12, %v2298_v12  ;;  %v493_v43 = vadd.f32 %v492_v31, %v467_v23 }
 0x136   :  { %v318_v44 = vpop.f32.mrf.mxu0 }
 0x137   :  { %2899 = vst [vmem:[#allocation17_spill] sm:$0xff] %v2303_v16  ;;  %v2312_v24 = vadd.f32 %v318_v44, %v2241_v46  ;;  %v469_v32 = vmul.f32 %v2303_v16, %v2303_v16  ;;  %v506_v61 = vadd.f32 %v505_v36, %v468_v29  ;;  %v410_v2 = vadd.f32 %v409_v38, %v2303_v16 }
 0x138   :  { %v320_v47 = vpop.f32.mrf.mxu0 }
 0x139   :  { %2900 = vst [vmem:[#allocation18_spill] sm:$0xff] %v2312_v24  ;;  %v2321_v33 = vadd.f32 %v320_v47, %v2238_v45  ;;  %v470_v44 = vmul.f32 %v2312_v24, %v2312_v24  ;;  %v422_v47 = vadd.f32 %v421_v35, %v2298_v12 }
 0x13a   :  { %v322_v50 = vpop.f32.mrf.mxu0 }
 0x13b   :  { %2901 = vst [vmem:[#allocation19_spill] sm:$0xff] %v2321_v33  ;;  %v2331_v56 = vadd.f32 %v322_v50, %v2241_v46  ;;  %v471_v50 = vmul.f32 %v2321_v33, %v2321_v33  ;;  %v507_v11 = vadd.f32 %v506_v61, %v470_v44 }
 0x13c   :  { %v326_v55 = vpop.f32.mrf.mxu0 }
 0x13d   :  { %2902 = vst [vmem:[#allocation20_spill] sm:$0xff] %v2331_v56  ;;  %v2334_v58 = vadd.f32 %v326_v55, %v2238_v45  ;;  %v423_v55 = vadd.f32 %v422_v47, %v2312_v24  ;;  %v472_v14 = vmul.f32 %v2331_v56, %v2331_v56 }
 0x13e   :  { %v328_v60 = vpop.f32.mrf.mxu0 }
 0x13f   :  { %v2347_v5 = vadd.f32 %v328_v60, %v2241_v46  ;;  %v473_v60 = vmul.f32 %v2334_v58, %v2334_v58  ;;  %v424_v22 = vadd.f32 %v423_v55, %v2331_v56 }
 0x140   :  { %v330_v4 = vpop.f32.mrf.mxu0 }
 0x141   :  { %v2326_v39 = vadd.f32 %v330_v4, %v2238_v45  ;;  %v494_v4 = vadd.f32 %v493_v43, %v469_v32  ;;  %v474_v23 = vmul.f32 %v2347_v5, %v2347_v5  ;;  %v508_v32 = vadd.f32 %v507_v11, %v472_v14 }
 0x142   :  { %v332_v13 = vpop.f32.mrf.mxu0 }
 0x143   :  { %v2338_v62 = vadd.f32 %v332_v13, %v2241_v46  ;;  %v475_v6 = vmul.f32 %v2326_v39, %v2326_v39  ;;  %v411_v13 = vadd.f32 %v410_v2, %v2321_v33  ;;  %v431_v26 = vadd.f32 %v2326_v39, %v2334_v58 }
 0x144   :  { %v336_v21 = vpop.f32.mrf.mxu0 }
 0x145   :  { %v2341_v0 = vadd.f32 %v336_v21, %v2238_v45  ;;  %v476_v15 = vmul.f32 %v2338_v62, %v2338_v62  ;;  %v495_v21 = vadd.f32 %v494_v4, %v471_v50  ;;  %v515_v27 = vadd.f32 %v475_v6, %v473_v60 }
 0x146   :  { %v338_v30 = vpop.f32.mrf.mxu0  ;;  %v444_v35 = vadd.f32 %v2338_v62, %v2347_v5  ;;  %v412_v60 = vrot.slane %v411_v13, 4 }
 0x147   :  { %v2353_v7 = vadd.f32 %v338_v30, %v2241_v46  ;;  %v477_v17 = vmul.f32 %v2341_v0, %v2341_v0  ;;  %v432_v36 = vadd.f32 %v431_v26, %v2341_v0 }
 0x148   :  { %v340_v41 = vpop.f32.mrf.mxu0 }
 0x149   :  { %v2356_v9 = vadd.f32 %v340_v41, %v2238_v45  ;;  %v478_v28 = vmul.f32 %v2353_v7, %v2353_v7  ;;  %v528_v41 = vadd.f32 %v476_v15, %v474_v23  ;;  %v516_v43 = vadd.f32 %v515_v27, %v477_v17 }
 0x14a   :  { %v342_v1 = vpop.f32.mrf.mxu0  ;;  %v445_v2 = vadd.f32 %v444_v35, %v2353_v7  ;;  %v509_v23 = vrot.slane %v508_v32, 4 }
 0x14b   :  { %v2368_v18 = vadd.f32 %v342_v1, %v2241_v46  ;;  %v479_v29 = vmul.f32 %v2356_v9, %v2356_v9  ;;  %v425_v1 = vrot.slane %v424_v22, 4  ;;  %v433_v4 = vadd.f32 %v432_v36, %v2356_v9 }
 0x14c   :  { %v346_v10 = vpop.f32.mrf.mxu0  ;;  %v529_v55 = vadd.f32 %v528_v41, %v478_v28  ;;  %v510_v56 = vadd.f32 %v509_v23, %v508_v32 }
 0x14d   :  { %v2371_v19 = vadd.f32 %v346_v10, %v2238_v45  ;;  %v480_v44 = vmul.f32 %v2368_v18, %v2368_v18  ;;  %v517_v6 = vadd.f32 %v516_v43, %v479_v29  ;;  %v446_v15 = vadd.f32 %v445_v2, %v2368_v18 }
 0x14e   :  { %v348_v20 = vpop.f32.mrf.mxu0  ;;  %v496_v43 = vrot.slane %v495_v21, 4  ;;  %v511_v23 = vrot.slane %v510_v56, 2 }
 0x14f   :  { %v2383_v30 = vadd.f32 %v348_v20, %v2241_v46  ;;  %v481_v47 = vmul.f32 %v2371_v19, %v2371_v19  ;;  %v434_v17 = vadd.f32 %v433_v4, %v2371_v19  ;;  %v530_v26 = vadd.f32 %v529_v55, %v480_v44 }
 0x150   :  { %v350_v31 = vpop.f32.mrf.mxu0 }
 0x151   :  { %v2389_v38 = vadd.f32 %v350_v31, %v2238_v45  ;;  %v482_v10 = vmul.f32 %v2383_v30, %v2383_v30  ;;  %v518_v27 = vadd.f32 %v517_v6, %v481_v47  ;;  %v447_v31 = vadd.f32 %v446_v15, %v2383_v30 }
 0x152   :  { %v352_v61 = vpop.f32.mrf.mxu0  ;;  %v413_v15 = vadd.f32 %v412_v60, %v411_v13 }
 0x153   :  { %v2398_v50 = vadd.f32 %v352_v61, %v2241_v46  ;;  %v483_v11 = vmul.f32 %v2389_v38, %v2389_v38  ;;  %v435_v35 = vadd.f32 %v434_v17, %v2389_v38  ;;  %v426_v61 = vadd.f32 %v425_v1, %v424_v22 }
 0x154   :  { %v356_v14 = vpop.f32.mrf.mxu0  ;;  %v531_v2 = vadd.f32 %v530_v26, %v482_v10  ;;  %v497_v26 = vadd.f32 %v496_v43, %v495_v21  ;;  %v414_v60 = vrot.slane %v413_v15, 2 }
 0x155   :  { %v2407_v20 = vadd.f32 %v356_v14, %v2238_v45  ;;  %v484_v28 = vmul.f32 %v2398_v50, %v2398_v50  ;;  %v519_v4 = vadd.f32 %v518_v27, %v483_v11  ;;  %v448_v47 = vadd.f32 %v447_v31, %v2398_v50 }
 0x156   :  { %v358_v29 = vpop.f32.mrf.mxu0  ;;  %v427_v27 = vrot.slane %v426_v61, 2 }
 0x157   :  { %v485_v36 = vmul.f32 %v2407_v20, %v2407_v20  ;;  %v2416_v41 = vadd.f32 %v358_v29, %v2241_v46  ;;  %v436_v55 = vadd.f32 %v435_v35, %v2407_v20  ;;  %v532_v17 = vadd.f32 %v531_v2, %v484_v28 }
 0x158   :  { %v360_v44 = vpop.f32.mrf.mxu0 }
 0x159   :  { %v486_v6 = vmul.f32 %v2416_v41, %v2416_v41  ;;  %v2423_v14 = vadd.f32 %v360_v44, %v2238_v45  ;;  %v520_v34 = vadd.f32 %v519_v4, %v485_v36  ;;  %v449_v22 = vadd.f32 %v448_v47, %v2416_v41 }
 0x15a   :  { %v362_v29 = vpop.f32.mrf.mxu0  ;;  %v428_v44 = vadd.f32 %v427_v27, %v426_v61  ;;  %v498_v47 = vrot.slane %v497_v26, 2 }
 0x15b   :  { %v437_v1 = vadd.f32 %v436_v55, %v2423_v14  ;;  %v487_v10 = vmul.f32 %v2423_v14, %v2423_v14  ;;  %v2430_v11 = vadd.f32 %v362_v29, %v2241_v46  ;;  %v533_v31 = vadd.f32 %v532_v17, %v486_v6 }
 0x15c   :  { %v415_v6 = vadd.f32 %v414_v60, %v413_v15  ;;  %v512_v17 = vadd.f32 %v511_v23, %v510_v56  ;;  %v429_v33 = vrot.slane %v428_v44, 1  ;;  %v499_v24 = vadd.f32 %v498_v47, %v497_v26 }
 0x15d   :  { %v438_v45 = vrot.slane %v437_v1, 4  ;;  %v521_v35 = vadd.f32 %v520_v34, %v487_v10  ;;  %v450_v13 = vadd.f32 %v449_v22, %v2430_v11  ;;  %v488_v32 = vmul.f32 %v2430_v11, %v2430_v11 }
 0x15e   :  { %v416_v8 = vrot.slane %v415_v6, 1  ;;  %v513_v61 = vrot.slane %v512_v17, 1 }
 0x15f   :  { %v439_v28 = vadd.f32 %v438_v45, %v437_v1  ;;  %v522_v36 = vrot.slane %v521_v35, 4  ;;  %v451_v2 = vrot.slane %v450_v13, 4  ;;  %v534_v4 = vadd.f32 %v533_v31, %v488_v32 }
 0x160   :  { %v417_v60 = vadd.f32 %v416_v8, %v415_v6  ;;  %v399_v8 = vld [vmem:[#allocation5 + $0x10] sm:$0xff] }
 0x161   :  { %v440_v46 = vrot.slane %v439_v28, 2  ;;  %v523_v55 = vadd.f32 %v522_v36, %v521_v35  ;;  %v452_v21 = vadd.f32 %v451_v2, %v450_v13  ;;  %v535_v43 = vrot.slane %v534_v4, 4 }
 0x162   :  { %v500_v13 = vrot.slane %v499_v24, 1  ;;  %v430_v36 = vadd.f32 %v429_v33, %v428_v44  ;;  %v514_v2 = vadd.f32 %v513_v61, %v512_v17  ;;  %v400_v33 = vld [vmem:[#allocation5 + $0x18] sm:$0xff]  ;;  %v398_v44 = vld [vmem:[#allocation5 + $0x8] sm:$0xff] }
 0x163   :  { %v441_v34 = vadd.f32 %v440_v46, %v439_v28  ;;  %v453_v29 = vrot.slane %v452_v21, 2  ;;  %v536_v22 = vadd.f32 %v535_v43, %v534_v4  ;;  %v524_v10 = vrot.slane %v523_v55, 2  ;;  %v397_v43 = vld [vmem:[#allocation5] sm:$0xff] }
 0x164   :  { %v501_v47 = vadd.f32 %v500_v13, %v499_v24  ;;  %v1951_v24 = vmov 0.0  }
 0x165   :  { %v442_v16 = vrot.slane %v441_v34, 1  ;;  %v454_v12 = vadd.f32 %v453_v29, %v452_v21  ;;  %v537_v1 = vrot.slane %v536_v22, 2  ;;  %v525_v45 = vadd.f32 %v524_v10, %v523_v55  ;;  %v403_v21 = vld [vmem:[#allocation5 + $0x30] sm:$0xff] }
 0x167   :  { %v455_v31 = vrot.slane %v454_v12, 1  ;;  %v538_v27 = vadd.f32 %v537_v1, %v536_v22  ;;  %v526_v32 = vrot.slane %v525_v45, 1  ;;  %v443_v35 = vadd.f32 %v442_v16, %v441_v34  ;;  %v402_v16 = vld [vmem:[#allocation5 + $0x28] sm:$0xff] }
 0x169   :  { %v456_v15 = vadd.f32 %v455_v31, %v454_v12  ;;  %v539_v56 = vrot.slane %v538_v27, 1  ;;  %v527_v23 = vadd.f32 %v526_v32, %v525_v45  ;;  %v546_v4 = vsel %vm545_vm1, %v443_v35, %v417_v60  ;;  %v401_v12 = vld [vmem:[#allocation5 + $0x20] sm:$0xff]  ;;  %v1389_v35 = vld [vmem:[%s2878_s9 + $0xf0] sm:$0xff] }
 0x16a   :  { %v1385_v60 = vld [vmem:[%s2878_s9 + $0xd0] sm:$0xff] }
 0x16b   :  { %v547_v28 = vsel %vm545_vm1, %v456_v15, %v430_v36  ;;  %v540_v26 = vadd.f32 %v539_v56, %v538_v27  ;;  %v625_v55 = vsel %vm545_vm1, %v527_v23, %v501_v47  ;;  %v1388_v36 = vld [vmem:[%s2878_s9 + $0xe8] sm:$0xff]  ;;  %v1387_v15 = vld [vmem:[%s2878_s9 + $0xe0] sm:$0xff]  ;;  %v1386_v56 = vld [vmem:[%s2878_s9 + $0xd8] sm:$0xff] }
 0x16c   :  { %614 = vmatprep.mubr.f32.mxu0 %v547_v28  ;;  %v1384_v23 = vld [vmem:[%s2878_s9 + $0xc8] sm:$0xff]  ;;  %v1383_v28 = vld [vmem:[%s2878_s9 + $0xc0] sm:$0xff] }
 0x16d   :  { %615 = vmatmul.mubr.f32.vlgmr.msra.gmra.mxu0 %v546_v4  ;;  %v626_v46 = vsel %vm545_vm1, %v540_v26, %v514_v2  ;;  %v1382_v2 = vld [vmem:[%s2878_s9 + $0xb8] sm:$0xff]  ;;  %v1381_v26 = vld [vmem:[%s2878_s9 + $0xb0] sm:$0xff]  ;;  %v1380_v4 = vld [vmem:[%s2878_s9 + $0xa8] sm:$0xff] }
 0x16e   :  { %693 = vmatprep.mubr.f32.mxu1 %v626_v46  ;;  %v1379_v47 = vld [vmem:[%s2878_s9 + $0xa0] sm:$0xff]  ;;  %v1378_v46 = vld [vmem:[%s2878_s9 + $0x98] sm:$0xff] }
 0x16f   :  { %694 = vmatmul.mubr.f32.vlgmr.msra.gmra.mxu1 %v625_v55  ;;  %v1377_v55 = vld [vmem:[%s2878_s9 + $0x90] sm:$0xff] }
 0x170   :  { %734 = vmatpush1.msra.mxu1 %v403_v21  ;;  %773 = vmatprep.mubr.f32.mxu1 %v1951_v24 }
 0x171   :  { %735 = vmatprep.subr.mxu1 %v402_v16 }
 0x172   :  { %736 = vmatpush1.msra.mxu1 %v401_v12 }
 0x173   :  { %737 = vmatprep.subr.mxu1 %v400_v33 }
 0x174   :  { %738 = vmatpush1.msra.mxu1 %v399_v8 }
 0x175   :  { %739 = vmatprep.subr.mxu1 %v398_v44 }
 0x176   :  { %740 = vmatpush1.msra.mxu1 %v397_v43 }
 0x177   :  { %807 = vmatprep.subr.mxu1 %v2222_v25  ;;  %v1390_v25 = vld [vmem:[%s2878_s9 + $0xf8] sm:$0xff] }
 0x22d   :  { %v1761_v6 = vpop.f32.mrf.mxu0 }
 0x22f   :  { %v1762_v17 = vpop.f32.mrf.mxu0  ;;  %v1796_v34 = vpop.f32.mrf.mxu1 }
 0x230   :  { %v1763_v29 = vadd.f32 %v1762_v17, %v1761_v6  ;;  %v1370_v17 = vld [vmem:[%s2878_s9 + $0x58] sm:$0xff] }
 0x231   :  { %v1797_v22 = vpop.f32.mrf.mxu1 }
 0x232   :  { %v620_v10 = vmul.f32 0.001953125, %v1763_v29  ;;  %v1798_v1 = vadd.f32 %v1797_v22, %v1796_v34  ;;  %v1357_v34 = vld [vmem:[%s2877_s8] sm:$0x1]  ;;  %v1358_v29 = vld [vmem:[%s2877_s8 + $0x1] sm:$0x1]  ;;  %v1369_v22 = vld [vmem:[%s2878_s9 + $0x50] sm:$0xff] }
 0x234   :  { %v700_v45 = vmul.f32 %v620_v10, %v620_v10  ;;  %v699_v31 = vmul.f32 0.001953125, %v1798_v1  ;;  %1695 = vmatmul.mubr.msk.f32.vlgmr.msra.gmra.mxu1 %vm705_vm2, %v620_v10  ;;  %v1368_v10 = vld [vmem:[%s2878_s9 + $0x48] sm:$0xff]  ;;  %v1367_v1 = vld [vmem:[%s2878_s9 + $0x40] sm:$0xff] }
 0x235   :  { %808 = vmatpush1.msra.mxu1 %v403_v21  ;;  %847 = vmatprep.mubr.f32.mxu1 %v1951_v24  ;;  %v1376_v21 = vld [vmem:[%s2878_s9 + $0x88] sm:$0xff] }
 0x236   :  { %v701_v61 = vsub.f32 %v699_v31, %v700_v45  ;;  %809 = vmatprep.subr.mxu1 %v402_v16  ;;  %v1375_v16 = vld [vmem:[%s2878_s9 + $0x80] sm:$0xff]  ;;  %v1405_v31 = vcombine.low %v1357_v34, %v1358_v29 }
 0x237   :  { %810 = vmatpush1.msra.mxu1 %v401_v12  ;;  %v1952_v12 = vmov 1966171168  }
 0x238   :  { %v702_v27 = vmax.f32 %v701_v61, 0.0  ;;  %811 = vmatprep.subr.mxu1 %v400_v33  ;;  %v888_v33 = vunpack.c.l.s4 %v1952_v12  ;;  %v1366_v61 = vld [vmem:[%s2878_s9 + $0x38] sm:$0xff] }
 0x239   :  { %812 = vmatpush1.msra.mxu1 %v399_v8  ;;  %v1374_v8 = vld [vmem:[%s2878_s9 + $0x78] sm:$0xff] }
 0x23a   :  { %v703_v32 = vadd.f32 1e-05, %v702_v27  ;;  %813 = vmatprep.subr.mxu1 %v398_v44  ;;  %v1373_v44 = vld [vmem:[%s2878_s9 + $0x70] sm:$0xff]  ;;  %v889_v6 = vunpack.c.0.s8 %v888_v33 }
 0x23b   :  { %814 = vmatpush1.msra.mxu1 %v397_v43  ;;  %v1372_v43 = vld [vmem:[%s2878_s9 + $0x68] sm:$0xff]  ;;  %v1365_v27 = vld [vmem:[%s2878_s9 + $0x30] sm:$0xff] }
 0x23c   :  { %1832 = vrsqrt.f32 %v703_v32  ;;  %1421 = vmatprep.subr.mxu1 %v1390_v25  ;;  %v2517_v45 = vsub.s32 %v889_v6, %v2226_v37  ;;  %v1364_v25 = vld [vmem:[%s2878_s9 + $0x28] sm:$0xff]  ;;  %v1363_v32 = vld [vmem:[%s2878_s9 + $0x20] sm:$0xff] }
 0x249   :  { %v1833_v13 = vpop.eup %1832 }
 0x24a   :  { %1696 = vmatmul.mubr.msk.f32.vlgmr.msra.gmra.mxu1 %vm705_vm2, %v1833_v13  ;;  %v1362_v13 = vld [vmem:[%s2878_s9 + $0x18] sm:$0xff] }
 0x24b   :  { %1422 = vmatpush1.msra.mxu1 %v1389_v35  ;;  %1485 = vmatprep.mubr.f32.mxu1 %v1951_v24  ;;  %v1371_v24 = vld [vmem:[%s2878_s9 + $0x60] sm:$0xff]  ;;  %v1412_v35 = vrot.slane %v1405_v31, %v2517_v45 }
 0x24c   :  { %1423 = vmatprep.subr.mxu1 %v1388_v36  ;;  %v1361_v36 = vld [vmem:[%s2878_s9 + $0x10] sm:$0xff] }
 0x24d   :  { %1424 = vmatpush1.msra.mxu1 %v1387_v15  ;;  %v1360_v15 = vld [vmem:[%s2878_s9 + $0x8] sm:$0xff] }
 0x24e   :  { %1425 = vmatprep.subr.mxu1 %v1386_v56  ;;  %v1359_v56 = vld [vmem:[%s2878_s9] sm:$0xff] }
 0x24f   :  { %1426 = vmatpush1.msra.mxu1 %v1385_v60  ;;  %v1419_v60 = vrot.slane %v1412_v35, %v2517_v45 }
 0x250   :  { %1427 = vmatprep.subr.mxu1 %v1384_v23 }
 0x251   :  { %1428 = vmatpush1.msra.mxu1 %v1383_v28  ;;  %v854_v28 = vld [vmem:[%s2873_s4] sm:$0x3] }
 0x252   :  { %1429 = vmatprep.subr.mxu1 %v1382_v2  ;;  %v859_v2 = vrot.slane %v854_v28, %v2229_v40 }
 0x253   :  { %1430 = vmatpush1.msra.mxu1 %v1381_v26 }
 0x254   :  { %1431 = vmatprep.subr.mxu1 %v1380_v4  ;;  %v863_v4 = vrot.slane %v854_v28, %v2235_v42 }
 0x255   :  { %1432 = vmatpush1.msra.mxu1 %v1379_v47 }
 0x256   :  { %1433 = vmatprep.subr.mxu1 %v1378_v46  ;;  %v868_v46 = vld [vmem:[%s2874_s5] sm:$0x3] }
 0x257   :  { %1434 = vmatpush1.msra.mxu1 %v1377_v55  ;;  %v875_v12 = vrot.slane %v868_v46, %v2229_v40 }
 0x258   :  { %1435 = vmatprep.subr.mxu1 %v1376_v21 }
 0x259   :  { %1436 = vmatpush1.msra.mxu1 %v1375_v16 }
 0x25a   :  { %1437 = vmatprep.subr.mxu1 %v1374_v8  ;;  %v879_v8 = vrot.slane %v868_v46, %v2235_v42 }
 0x25b   :  { %1438 = vmatpush1.msra.mxu1 %v1373_v44 }
 0x25c   :  { %1439 = vmatprep.subr.mxu1 %v1372_v43 }
 0x25d   :  { %1440 = vmatpush1.msra.mxu1 %v1371_v24 }
 0x25e   :  { %1441 = vmatprep.subr.mxu1 %v1370_v17 }
 0x25f   :  { %1442 = vmatpush1.msra.mxu1 %v1369_v22 }
 0x260   :  { %1443 = vmatprep.subr.mxu1 %v1368_v10  ;;  %v1150_v10 = vld [vmem:[%s2882_s13] sm:$0x3] }
 0x261   :  { %1444 = vmatpush1.msra.mxu1 %v1367_v1 }
 0x262   :  { %1445 = vmatprep.subr.mxu1 %v1366_v61 }
 0x263   :  { %1446 = vmatpush1.msra.mxu1 %v1365_v27 }
 0x264   :  { %1447 = vmatprep.subr.mxu1 %v1364_v25  ;;  %v2569_v25 = vrot.slane %v1150_v10, %v2229_v40 }
 0x265   :  { %1448 = vmatpush1.msra.mxu1 %v1363_v32 }
 0x266   :  { %1449 = vmatprep.subr.mxu1 %v1362_v13 }
 0x267   :  { %1450 = vmatpush1.msra.mxu1 %v1361_v36 }
 0x268   :  { %1451 = vmatprep.subr.mxu1 %v1360_v15 }
 0x269   :  { %1452 = vmatpush1.msra.mxu1 %v1359_v56 }
 0x26a   :  { %1486 = vmatmul.mubr.f32.vlgmr.msra.gmra.mxu1 %v1419_v60  ;;  %v2583_v60 = vrot.slane %v1150_v10, %v2235_v42 }
 0x2f4   :  { %v775_v23 = vpop.f32.mrf.mxu1 }
 0x2f6   :  { %v777_v26 = vpop.f32.mrf.mxu1 }
 0x30a   :  { %v849_v47 = vpop.f32.mrf.mxu1 }
 0x30b   :  { %v866_v55 = vmul.f32 %v859_v2, %v849_v47 }
 0x30c   :  { %v851_v21 = vpop.f32.mrf.mxu1 }
 0x30d   :  { %v869_v16 = vmul.f32 %v866_v55, %v775_v23  ;;  %v867_v33 = vmul.f32 %v863_v4, %v851_v21 }
 0x30f   :  { %v870_v44 = vmul.f32 %v867_v33, %v777_v26  ;;  %v886_v43 = vcombine.low %v866_v55, %v867_v33  ;;  %v882_v24 = vsub.f32 %v875_v12, %v869_v16 }
 0x311   :  { %v883_v6 = vsub.f32 %v879_v8, %v870_v44  ;;  %v893_v17 = vrot.slane %v886_v43, %v2517_v45 }
 0x313   :  { %v894_v34 = vcombine.high %v893_v17, %v893_v17  ;;  %v901_v29 = vrot.slane %v893_v17, %v2517_v45  ;;  %v963_v22 = vcombine.low %v882_v24, %v883_v6 }
 0x315   :  { %v908_v1 = vrot.slane %v894_v34, %v2517_v45  ;;  %v2562_v31 = vrot.slane %v901_v29, %v2229_v40  ;;  %v2565_v61 = vrot.slane %v901_v29, %v2235_v42  ;;  %v970_v27 = vrot.slane %v963_v22, %v2517_v45 }
 0x317   :  { %v2572_v32 = vrot.slane %v908_v1, %v2229_v40  ;;  %v2575_v35 = vrot.slane %v908_v1, %v2235_v42  ;;  %v971_v13 = vcombine.high %v970_v27, %v970_v27  ;;  %v978_v36 = vrot.slane %v970_v27, %v2517_v45 }
 0x318   :  { %v931_v15 = vmul.f32 %v2562_v31, %v2244_v48  ;;  %v932_v56 = vmul.f32 %v2565_v61, %v2247_v49  ;;  %v929_v23 = vmul.f32 %v2562_v31, %v2250_v51  ;;  %v930_v48 = vmul.f32 %v2565_v61, %v2256_v53 }
 0x319   :  { %v985_v28 = vrot.slane %v971_v13, %v2517_v45  ;;  %v2589_v2 = vrot.slane %v978_v36, %v2229_v40  ;;  %v2592_v26 = vrot.slane %v978_v36, %v2235_v42  ;;  %v955_v49 = vmul.f32 %v2572_v32, %v2389_v38 }
 0x31a   :  { %v956_v4 = vmul.f32 %v2575_v35, %v2398_v50  ;;  %v957_v51 = vmul.f32 %v2572_v32, %v2407_v20  ;;  %v958_v47 = vmul.f32 %v2575_v35, %v2416_v41  ;;  %v959_v38 = vmul.f32 %v2572_v32, %v2423_v14  ;;  %v2625_v14 = vld [vmem:[%s2879_s10] sm:$0x3]  ;;  %s1953_s10 = smov [#allocation7]  }
 0x31b   :  { %v2605_v46 = vrot.slane %v985_v28, %v2229_v40  ;;  %v2608_v55 = vrot.slane %v985_v28, %v2235_v42  ;;  %v1008_v53 = vadd.f32 %v2589_v2, %v931_v15  ;;  %v1009_v21 = vadd.f32 %v2592_v26, %v932_v56  ;;  %s1627_s20 = sshll.u32 %s1953_s10, 4  ;;  %s1628_s20 = int_to_ptr.vmem [resolvable:$true] %s1627_s20 }
 0x31c   :  { %v960_v50 = vmul.f32 %v2575_v35, %v2430_v11  ;;  %v1006_v20 = vadd.f32 %v2589_v2, %v929_v23  ;;  %v1007_v41 = vadd.f32 %v2592_v26, %v930_v48  ;;  %v1396_v1 = vrot.slane %v2625_v14, %v2229_v40  ;;  %s1876_s21 = scalar_lea.vmem %s1628_s20, 2048  ;;  %p1881_p11 = scmp.lt.s32.totalorder %s1628_s20, %s1628_s20 }
 0x31d   :  { %v1164_v16 = vmul.f32 %v2569_v25, %v1008_v53  ;;  %v1165_v12 = vmul.f32 %v2583_v60, %v1009_v21  ;;  %v1714_v33 = vpack.c.bf16 %v1009_v21, %v1008_v53  ;;  %v1032_v8 = vadd.f32 %v2605_v46, %v955_v49  ;;  %p1877_p10 = scmp.ne.s32.totalorder %s1628_s20, %s1876_s21  ;;  %p1882_p12 = scmp.lt.s32.totalorder %s1876_s21, %s1876_s21 }
 0x31e   :  { %v1033_v44 = vadd.f32 %v2608_v55, %v956_v4  ;;  %v1034_v11 = vadd.f32 %v2605_v46, %v957_v51  ;;  %v1035_v43 = vadd.f32 %v2608_v55, %v958_v47  ;;  %v1036_v24 = vadd.f32 %v2605_v46, %v959_v38 }
 0x31f   :  { %v1197_v6 = vadd.f32 %v1165_v12, %v1164_v16  ;;  %1135 = vst [vmem:[#allocation7 + $0x8] sm:$0xff] %v1714_v33  ;;  %v1188_v17 = vmul.f32 %v2569_v25, %v1032_v8  ;;  %v1037_v34 = vadd.f32 %v2608_v55, %v960_v50  ;;  %v945_v13 = vmul.f32 %v2572_v32, %v2334_v58  ;;  %p1883_p13 = por %p1882_p12, %p1881_p11 }
 0x320   :  { %v1189_v29 = vmul.f32 %v2583_v60, %v1033_v44  ;;  %v1726_v22 = vpack.c.bf16 %v1033_v44, %v1032_v8  ;;  %v1727_v10 = vpack.c.bf16 %v1035_v43, %v1034_v11  ;;  %v1190_v36 = vmul.f32 %v2569_v25, %v1034_v11 }
 0x321   :  { %1198 = vadd.xlane.f32.xlu1 %v1197_v6  ;;  %v1728_v27 = vpack.c.bf16 %v1037_v34, %v1036_v24  ;;  %v1162_v15 = vmul.f32 %v2569_v25, %v1006_v20  ;;  %v1713_v56 = vpack.c.bf16 %v1007_v41, %v1006_v20  ;;  %v946_v23 = vmul.f32 %v2575_v35, %v2347_v5  ;;  %p1884_p0 = pnand %p1883_p13, %p1877_p10 }
 0x322   :  { %1147 = vst [vmem:[#allocation7 + $0x68] sm:$0xff] %v1726_v22  ;;  %1148 = vst [vmem:[#allocation7 + $0x70] sm:$0xff] %v1727_v10  ;;  %v1233_v28 = vadd.f32 %v1189_v29, %v1188_v17  ;;  %v1191_v48 = vmul.f32 %v2583_v60, %v1035_v43  ;;  %v1022_v49 = vadd.f32 %v2605_v46, %v945_v13 }
 0x323   :  { %1149 = vst [vmem:[#allocation7 + $0x78] sm:$0xff] %v1728_v27  ;;  %v947_v4 = vmul.f32 %v2572_v32, %v2326_v39  ;;  %v1192_v58 = vmul.f32 %v2569_v25, %v1036_v24  ;;  %1134 = vst [vmem:[#allocation7] sm:$0xff] %v1713_v56  ;;  %v1023_v51 = vadd.f32 %v2608_v55, %v946_v23 }
 0x324   :  { %v948_v47 = vmul.f32 %v2575_v35, %v2338_v62  ;;  %v933_v5 = vmul.f32 %v2562_v31, %v2253_v52  ;;  %v1193_v53 = vmul.f32 %v2583_v60, %v1037_v34  ;;  %v934_v38 = vmul.f32 %v2565_v61, %v2259_v54 }
 0x325   :  { %1234 = vadd.xlane.f32.xlu1 %v1233_v28  ;;  %v1024_v21 = vadd.f32 %v2605_v46, %v947_v4  ;;  %v949_v39 = vmul.f32 %v2572_v32, %v2341_v0  ;;  %v1163_v50 = vmul.f32 %v2583_v60, %v1007_v41  ;;  %v1721_v20 = vpack.c.bf16 %v1023_v51, %v1022_v49 }
 0x326   :  { %v2659_v16 = vadd.f32 %v2608_v55, %v948_v47  ;;  %v2662_v62 = vadd.f32 %v2589_v2, %v933_v5  ;;  %v1236_v52 = vadd.f32 %v1191_v48, %v1190_v36  ;;  %v2665_v12 = vadd.f32 %v2592_v26, %v934_v38 }
 0x327   :  { %v950_v33 = vmul.f32 %v2575_v35, %v2353_v7  ;;  %v1026_v54 = vadd.f32 %v2605_v46, %v949_v39  ;;  %1142 = vst [vmem:[#allocation7 + $0x40] sm:$0xff] %v1721_v20  ;;  %v1400_v41 = vrot.slane %v2625_v14, %v2235_v42  ;;  %v1239_v24 = vadd.f32 %v1193_v53, %v1192_v58 }
 0x328   :  { %v1722_v0 = vpack.c.bf16 %v2659_v16, %v1024_v21  ;;  %v1715_v8 = vpack.c.bf16 %v2665_v12, %v2662_v62  ;;  %v935_v7 = vmul.f32 %v2562_v31, %v2264_v57  ;;  %v936_v6 = vmul.f32 %v2565_v61, %v2269_v59 }
 0x329   :  { %1237 = vadd.xlane.f32.xlu1 %v1236_v52  ;;  %v1027_v44 = vadd.f32 %v2608_v55, %v950_v33  ;;  %v1182_v11 = vmul.f32 %v2569_v25, %v1026_v54  ;;  %v1194_v14 = vadd.f32 %v1163_v50, %v1162_v15  ;;  %v951_v29 = vmul.f32 %v2572_v32, %v2356_v9 }
 0x32a   :  { %v1487_v43 = vpop.f32.mrf.mxu1  ;;  %1143 = vst [vmem:[#allocation7 + $0x48] sm:$0xff] %v1722_v0  ;;  %1136 = vst [vmem:[#allocation7 + $0x10] sm:$0xff] %v1715_v8  ;;  %v1178_v10 = vmul.f32 %v2569_v25, %v1022_v49  ;;  %v1012_v13 = vadd.f32 %v2589_v2, %v935_v7  ;;  %v1013_v57 = vadd.f32 %v2592_v26, %v936_v6 }
 0x32b   :  { %v2681_v17 = vadd.f32 %v1487_v43, %v1396_v1  ;;  %v1723_v34 = vpack.c.bf16 %v1027_v44, %v1026_v54  ;;  %v1183_v27 = vmul.f32 %v2583_v60, %v1027_v44  ;;  %v1179_v59 = vmul.f32 %v2583_v60, %v1023_v51 }
 0x32c   :  { %v1489_v22 = vpop.f32.mrf.mxu1  ;;  %v952_v1 = vmul.f32 %v2575_v35, %v2368_v18  ;;  %v1028_v9 = vadd.f32 %v2605_v46, %v951_v29  ;;  %v1716_v56 = vpack.c.bf16 %v1013_v57, %v1012_v13  ;;  %v1168_v23 = vmul.f32 %v2569_v25, %v1012_v13 }
 0x32d   :  { %v2689_v36 = vadd.f32 %v1489_v22, %v1400_v41  ;;  %1240 = vadd.xlane.f32.xlu1 %v1239_v24  ;;  %1144 = vst [vmem:[#allocation7 + $0x50] sm:$0xff] %v1723_v34  ;;  %v2695_v15 = vadd.f32 %v1183_v27, %v1182_v11  ;;  %v1169_v28 = vmul.f32 %v2583_v60, %v1013_v57  ;;  %v1493_v48 = vsel %vm1492_vm3, %v2681_v17, 0.0  ;;  %v2904_v41 = vld [vmem:[#allocation16_spill] sm:$0xff]  ;;  %v2905_v34 = vld [vmem:[#allocation17_spill] sm:$0xff]  ;;  %v2907_v57 = vld [vmem:[#allocation19_spill] sm:$0xff] }
 0x32e   :  { %v1029_v4 = vadd.f32 %v2608_v55, %v952_v1  ;;  %v1184_v58 = vmul.f32 %v2569_v25, %v1028_v9  ;;  %1137 = vst [vmem:[#allocation7 + $0x18] sm:$0xff] %v1716_v56  ;;  %v937_v47 = vmul.f32 %v2562_v31, %v2276_v63  ;;  %v938_v5 = vmul.f32 %v2565_v61, %v2285_v3  ;;  %v2908_v1 = vld [vmem:[#allocation20_spill] sm:$0xff] }
 0x32f   :  { %v1494_v49 = vsel %vm1492_vm3, %v2689_v36, 0.0  ;;  %v2705_v51 = vadd.f32 %v1169_v28, %v1168_v23  ;;  %v1180_v53 = vmul.f32 %v2569_v25, %v1024_v21  ;;  %v953_v50 = vmul.f32 %v2572_v32, %v2371_v19  ;;  %v2903_v21 = vld [vmem:[#allocation15_spill] sm:$0xff] }
 0x330   :  { %v1495_v18 = vadd.f32 %v1494_v49, %v1493_v48  ;;  %v1724_v38 = vpack.c.bf16 %v1029_v4, %v1028_v9  ;;  %v1185_v39 = vmul.f32 %v2583_v60, %v1029_v4  ;;  %v1218_v20 = vadd.f32 %v1179_v59, %v1178_v10  ;;  %v2906_v10 = vld [vmem:[#allocation18_spill] sm:$0xff] }
 0x331   :  { %v1014_v52 = vadd.f32 %v2589_v2, %v937_v47  ;;  %v1015_v33 = vadd.f32 %v2592_v26, %v938_v5  ;;  %v954_v63 = vmul.f32 %v2575_v35, %v2383_v30  ;;  %v1030_v3 = vadd.f32 %v2605_v46, %v953_v50 }
 0x332   :  { %1496 = vadd.xlane.f32.xlu0 %v1495_v18  ;;  %1145 = vst [vmem:[#allocation7 + $0x58] sm:$0xff] %v1724_v38  ;;  %v1227_v54 = vadd.f32 %v1185_v39, %v1184_v58  ;;  %v939_v0 = vmul.f32 %v2562_v31, %v2903_v21  ;;  %v940_v8 = vmul.f32 %v2565_v61, %v2904_v41 }
 0x333   :  { %v1717_v19 = vpack.c.bf16 %v1015_v33, %v1014_v52  ;;  %v1170_v32 = vmul.f32 %v2569_v25, %v1014_v52  ;;  %v1171_v44 = vmul.f32 %v2583_v60, %v1015_v33  ;;  %v1031_v11 = vadd.f32 %v2608_v55, %v954_v63 }
 0x334   :  { %v1181_v30 = vmul.f32 %v2583_v60, %v2659_v16  ;;  %v1186_v35 = vmul.f32 %v2569_v25, %v1030_v3  ;;  %v1016_v46 = vadd.f32 %v2589_v2, %v939_v0  ;;  %v1017_v43 = vadd.f32 %v2592_v26, %v940_v8 }
 0x335   :  { %1138 = vst [vmem:[#allocation7 + $0x20] sm:$0xff] %v1717_v19  ;;  %v1206_v24 = vadd.f32 %v1171_v44, %v1170_v32  ;;  %v1725_v7 = vpack.c.bf16 %v1031_v11, %v1030_v3  ;;  %v1187_v6 = vmul.f32 %v2583_v60, %v1031_v11  ;;  %v941_v29 = vmul.f32 %v2562_v31, %v2905_v34 }
 0x336   :  { %1195 = vadd.xlane.f32.xlu0 %v1194_v14  ;;  %v1718_v22 = vpack.c.bf16 %v1017_v43, %v1016_v46  ;;  %v1172_v55 = vmul.f32 %v2569_v25, %v1016_v46  ;;  %v1173_v16 = vmul.f32 %v2583_v60, %v1017_v43  ;;  %v942_v27 = vmul.f32 %v2565_v61, %v2906_v10 }
 0x337   :  { %1146 = vst [vmem:[#allocation7 + $0x60] sm:$0xff] %v1725_v7  ;;  %v1230_v13 = vadd.f32 %v1187_v6, %v1186_v35  ;;  %v1018_v14 = vadd.f32 %v2589_v2, %v941_v29  ;;  %v943_v59 = vmul.f32 %v2562_v31, %v2907_v57  ;;  %v944_v9 = vmul.f32 %v2565_v61, %v2908_v1 }
 0x338   :  { %1139 = vst [vmem:[#allocation7 + $0x28] sm:$0xff] %v1718_v22  ;;  %v1209_v56 = vadd.f32 %v1173_v16, %v1172_v55  ;;  %v1019_v23 = vadd.f32 %v2592_v26, %v942_v27  ;;  %v1166_v4 = vmul.f32 %v2569_v25, %v2662_v62  ;;  %v1167_v31 = vmul.f32 %v2583_v60, %v2665_v12 }
 0x339   :  { %v1174_v28 = vmul.f32 %v2569_v25, %v1018_v14  ;;  %v1020_v48 = vadd.f32 %v2589_v2, %v943_v59  ;;  %v1021_v49 = vadd.f32 %v2592_v26, %v944_v9  ;;  %v1221_v18 = vadd.f32 %v1181_v30, %v1180_v53 }
 0x33a   :  { %1219 = vadd.xlane.f32.xlu0 %v1218_v20  ;;  %v1719_v58 = vpack.c.bf16 %v1019_v23, %v1018_v14  ;;  %v1175_v61 = vmul.f32 %v2583_v60, %v1019_v23  ;;  %v1200_v26 = vadd.f32 %v1167_v31, %v1166_v4 }
 0x33b   :  { %v1720_v47 = vpack.c.bf16 %v1021_v49, %v1020_v48  ;;  %v1176_v5 = vmul.f32 %v2569_v25, %v1020_v48  ;;  %v1177_v38 = vmul.f32 %v2583_v60, %v1021_v49 }
 0x33c   :  { %1140 = vst [vmem:[#allocation7 + $0x30] sm:$0xff] %v1719_v58  ;;  %v1212_v39 = vadd.f32 %v1175_v61, %v1174_v28 }
 0x33d   :  { %1141 = vst [vmem:[#allocation7 + $0x38] sm:$0xff] %v1720_v47  ;;  %v1215_v2 = vadd.f32 %v1177_v38, %v1176_v5 }
 0x33e   :  { %1222 = vadd.xlane.f32.xlu0 %v1221_v18 }
 0x342   :  { %1201 = vadd.xlane.f32.xlu0 %v1200_v26 }
 0x3bb   :  { %v1497_v62 = vpop.xlane.xlu0 %1496 }
 0x3bc   :  { %v1499_v50 = vmul.f32 0.00390625, %v1497_v62 }
 0x3be   :  { %v2756_v12 = vsub.f32 %v2681_v17, %v1499_v50  ;;  %v2759_v20 = vsub.f32 %v2689_v36, %v1499_v50 }
 0x3c0   :  { %v1502_v25 = vmul.f32 %v2756_v12, %v2756_v12  ;;  %v1503_v60 = vmul.f32 %v2759_v20, %v2759_v20 }
 0x3c2   :  { %v1504_v53 = vsel %vm1492_vm3, %v1502_v25, 0.0  ;;  %v1505_v52 = vsel %vm1492_vm3, %v1503_v60, 0.0 }
 0x3c3   :  { %v1506_v33 = vadd.f32 %v1505_v52, %v1504_v53 }
 0x3c5   :  { %1507 = vadd.xlane.f32.xlu0 %v1506_v33 }
 0x3c9   :  { %1225 = vadd.xlane.f32.xlu0 %v2695_v15 }
 0x3cd   :  { %1204 = vadd.xlane.f32.xlu0 %v2705_v51 }
 0x3d1   :  { %1228 = vadd.xlane.f32.xlu0 %v1227_v54 }
 0x3d5   :  { %1207 = vadd.xlane.f32.xlu0 %v1206_v24 }
 0x3d9   :  { %1231 = vadd.xlane.f32.xlu0 %v1230_v13 }
 0x3dd   :  { %1210 = vadd.xlane.f32.xlu0 %v1209_v56 }
 0x3e1   :  { %1213 = vadd.xlane.f32.xlu0 %v1212_v39 }
 0x3e5   :  { %1216 = vadd.xlane.f32.xlu0 %v1215_v2 }
 0x3e6   :  { %1887 = shalt.err (!%p1884_p0)
}
 0x3e7   :  { %1633 = dma.vmem_to_hbm [thread:$0]  %s1628_s20, 2048, %s2883_s14, [#allocation4], %s1945_s24, %s1945_s24, %s1946_s25   ;;  %v2775_v17 = vpop.xlane.xlu0 %1195  ;;  %v1545_v51 = vpop.permute.xlu1 %1544  ;;  %v2909_v30 = vlaneseq  ;;  %vm1269_vm4 = vcmask 130112   ;;  %vm1276_vm5 = vcmask 195712   ;;  %vm1283_vm6 = vcmask 261312  }
 0x3e8   :  { %v1550_v3 = vrot.slane %v1545_v51, %v2229_v40  ;;  %v1514_v14 = vld [vmem:[%s2880_s11] sm:$0x3]  ;;  %vm1297_vm7 = vcmask 392512   ;;  %vm1290_vm8 = vcmask 326912   ;;  %vm1304_vm9 = vcmask 458112   ;;  %s1954_s11 = smov [#allocation8]  }
 0x3e9   :  { %v1259_v35 = vand.u32 127, %v2909_v30  ;;  %v1528_v56 = vld [vmem:[%s2881_s12] sm:$0x3]  ;;  %v1519_v58 = vrot.slane %v1514_v14, %v2229_v40  ;;  %v1523_v61 = vrot.slane %v1514_v14, %v2235_v42  ;;  %vm1311_vm10 = vcmask 523712   ;;  %s1639_s12 = sshll.u32 %s1954_s11, 4  ;;  %s1955_s23 = smov [#allocation10]   ;;  %s1640_s12 = int_to_ptr.vmem [resolvable:$true] %s1639_s12 }
 0x3ea   :  { %v1533_v38 = vrot.slane %v1528_v56, %v2229_v40  ;;  %v1537_v2 = vrot.slane %v1528_v56, %v2235_v42  ;;  %vm1354_vm11 = vcmask 516096   ;;  %vm2844_vm12 = vcmp.lt.s32.totalorder %v2909_v30, 256  ;;  %s1651_s27 = sshll.u32 %s1955_s23, 4  ;;  %s1896_s28 = scalar_lea.vmem %s1640_s12, 64  ;;  %s1652_s27 = int_to_ptr.vmem [resolvable:$true] %s1651_s27 }
 0x3eb   :  { %v1220_v36 = vpop.xlane.xlu0 %1219  ;;  %v1554_v54 = vpop.permute.xlu1 %1553  ;;  %v1264_v7 = vadd.s32 4294967288, %v1259_v35  ;;  %v1292_v6 = vadd.s32 4294967256, %v1259_v35  ;;  %v1299_v34 = vadd.s32 4294967248, %v1259_v35  ;;  %v1271_v29 = vadd.s32 4294967280, %v1259_v35  ;;  %p1897_p1 = scmp.ne.s32.totalorder %s1640_s12, %s1896_s28  ;;  %p1901_p2 = scmp.lt.s32.totalorder %s1640_s12, %s1640_s12 }
 0x3ec   :  { %v1559_v21 = vrot.slane %v1554_v54, %v2229_v40  ;;  %v1306_v22 = vadd.s32 4294967240, %v1259_v35  ;;  %v1278_v55 = vadd.s32 4294967272, %v1259_v35  ;;  %v1285_v23 = vadd.s32 4294967264, %v1259_v35  ;;  %p1902_p3 = scmp.lt.s32.totalorder %s1896_s28, %s1896_s28 }
 0x3ed   :  { %v1267_v13 = vsub.s32 %v1264_v7, %v2226_v37  ;;  %v2799_v57 = vsub.s32 %v1292_v6, %v2226_v37  ;;  %v2802_v59 = vsub.s32 %v1299_v34, %v2226_v37  ;;  %v1274_v9 = vsub.s32 %v1271_v29, %v2226_v37 }
 0x3ee   :  { %v1562_v8 = vcombine.low %v1550_v3, %v1559_v21  ;;  %v2809_v28 = vsub.s32 %v1306_v22, %v2226_v37  ;;  %v1262_v48 = vsub.s32 %v1259_v35, %v2226_v37  ;;  %v1281_v4 = vsub.s32 %v1278_v55, %v2226_v37  ;;  %p1903_p4 = por %p1902_p3, %p1901_p2 }
 0x3ef   :  { %v1223_v15 = vpop.xlane.xlu0 %1222  ;;  %v2781_v19 = vpop.xlane.xlu1 %1198  ;;  %v1288_v50 = vsub.s32 %v1285_v23, %v2226_v37 }
 0x3f0   :  { %v2784_v11 = vrot.slane %v1562_v8, %v2517_v45  ;;  %v1320_v49 = vrot.slane %v1223_v15, %v1267_v13  ;;  %v1316_v5 = vrot.slane %v1220_v36, %v1262_v48  ;;  %v1268_v35 = vrot.slane %v2781_v19, %v1267_v13  ;;  %p1904_p5 = pnand %p1903_p4, %p1897_p1 }
 0x3f2   :  { %v1570_v24 = vcombine.high %v2784_v11, %v2784_v11  ;;  %v1577_v10 = vrot.slane %v2784_v11, %v2517_v45  ;;  %v1321_v60 = vsel %vm1269_vm4, %v1320_v49, %v1316_v5 }
 0x3f3   :  { %v2777_v63 = vpop.xlane.xlu0 %1201  ;;  %v1235_v43 = vpop.xlane.xlu1 %1234 }
 0x3f4   :  { %v1584_v27 = vrot.slane %v1570_v24, %v2517_v45  ;;  %v1340_v25 = vrot.slane %v1235_v43, %v2799_v57 }
 0x3f7   :  { %v1238_v1 = vpop.xlane.xlu1 %1237 }
 0x3f8   :  { %v1345_v42 = vrot.slane %v1238_v1, %v2802_v59 }
 0x3fb   :  { %v1241_v52 = vpop.xlane.xlu1 %1240 }
 0x3fc   :  { %v1350_v54 = vrot.slane %v1241_v52, %v2809_v28 }
 0x44e   :  { %v1508_v0 = vpop.xlane.xlu0 %1507 }
 0x44f   :  { %v1509_v41 = vmul.f32 0.00390625, %v1508_v0  ;;  %v1263_v0 = vrot.slane %v2775_v17, %v1262_v48 }
 0x451   :  { %v1510_v32 = vadd.f32 1e-05, %v1509_v41  ;;  %v1270_v17 = vsel %vm1269_vm4, %v1268_v35, %v1263_v0 }
 0x452   :  { %v1226_v44 = vpop.xlane.xlu0 %1225 }
 0x453   :  { %1834 = vrsqrt.f32 %v1510_v32  ;;  %v1325_v18 = vrot.slane %v1226_v44, %v1274_v9  ;;  %v1275_v44 = vrot.slane %v2777_v63, %v1274_v9 }
 0x455   :  { %v1326_v40 = vsel %vm1276_vm5, %v1325_v18, %v1321_v60  ;;  %v1277_v63 = vsel %vm1276_vm5, %v1275_v44, %v1270_v17 }
 0x456   :  { %v2787_v46 = vpop.xlane.xlu0 %1204 }
 0x457   :  { %v1282_v43 = vrot.slane %v2787_v46, %v1281_v4 }
 0x459   :  { %v1284_v46 = vsel %vm1283_vm6, %v1282_v43, %v1277_v63 }
 0x45a   :  { %v1229_v16 = vpop.xlane.xlu0 %1228 }
 0x45b   :  { %v1330_v39 = vrot.slane %v1229_v16, %v1281_v4 }
 0x45e   :  { %v2813_v31 = vpop.xlane.xlu0 %1207 }
 0x45f   :  { %v1289_v7 = vrot.slane %v2813_v31, %v1288_v50 }
 0x460   :  { %v1835_v47 = vpop.eup %1834 }
 0x461   :  { %v1512_v26 = vmul.f32 %v1835_v47, %v2756_v12  ;;  %v1513_v62 = vmul.f32 %v1835_v47, %v2759_v20  ;;  %v1331_v12 = vsel %vm1283_vm6, %v1330_v39, %v1326_v40 }
 0x462   :  { %v1232_v53 = vpop.xlane.xlu0 %1231 }
 0x463   :  { %v1526_v33 = vmul.f32 %v1519_v58, %v1512_v26  ;;  %v1527_v36 = vmul.f32 %v1523_v61, %v1513_v62  ;;  %v1335_v15 = vrot.slane %v1232_v53, %v1288_v50 }
 0x465   :  { %v1540_v37 = vadd.f32 %v1533_v38, %v1526_v33  ;;  %v1541_v20 = vadd.f32 %v1537_v2, %v1527_v36  ;;  %v1336_v51 = vsel %vm1290_vm8, %v1335_v15, %v1331_v12 }
 0x466   :  { %v1341_v3 = vsel %vm1297_vm7, %v1340_v25, %v1336_v51  ;;  %v1211_v21 = vpop.xlane.xlu0 %1210 }
 0x467   :  { %v1346_v41 = vsel %vm1304_vm9, %v1345_v42, %v1341_v3  ;;  %v1587_v8 = vmul.f32 %v1577_v10, %v1540_v37  ;;  %v1588_v32 = vmul.f32 %v1584_v27, %v1541_v20  ;;  %v1296_v34 = vrot.slane %v1211_v21, %v2799_v57 }
 0x468   :  { %v1351_v11 = vsel %vm1311_vm10, %v1350_v54, %v1346_v41  ;;  %v1291_v10 = vsel %vm1290_vm8, %v1289_v7, %v1284_v46 }
 0x469   :  { %1356 = vst.msk [vmem:[#allocation10 + $0x1] sm:$0x1] %vm1354_vm11, %v1351_v11  ;;  %v1591_v24 = vcombine.low %v1587_v8, %v1588_v32  ;;  %v1298_v13 = vsel %vm1297_vm7, %v1296_v34, %v1291_v10 }
 0x46a   :  { %v1214_v6 = vpop.xlane.xlu0 %1213 }
 0x46b   :  { %v1598_v29 = vrot.slane %v1591_v24, %v2517_v45  ;;  %v1303_v22 = vrot.slane %v1214_v6, %v2802_v59 }
 0x46d   :  { %v1599_v55 = vcombine.high %v1598_v29, %v1598_v29  ;;  %v1606_v16 = vrot.slane %v1598_v29, %v2517_v45  ;;  %v1305_v57 = vsel %vm1304_vm9, %v1303_v22, %v1298_v13 }
 0x46e   :  { %v1217_v27 = vpop.xlane.xlu0 %1216 }
 0x46f   :  { %v1310_v14 = vrot.slane %v1217_v27, %v2809_v28  ;;  %v1613_v30 = vrot.slane %v1599_v55, %v2517_v45  ;;  %1620 = vst.msk [vmem:[#allocation8] sm:$0x3] %vm2844_vm12, %v1606_v16 }
 0x471   :  { %v1312_v59 = vsel %vm1311_vm10, %v1310_v14, %v1305_v57  ;;  %1621 = vst.msk [vmem:[#allocation8 + $0x2] sm:$0x3] %vm2844_vm12, %v1613_v30 }
 0x472   :  { %1355 = vst.msk [vmem:[#allocation10] sm:$0x1] %vm1354_vm11, %v1312_v59 }
 0x473   :  { %1907 = shalt.err (!%p1904_p5)
}
 0x474   :  { %s1956_s29 = smov 32   ;;  %s1957_s30 = smov 2  }
 0x475   :  { %1645 = dma.vmem_to_hbm [thread:$0]  %s1640_s12, 64, %s2884_s15, [#allocation9], %s1956_s29, %s1956_s29, %s1957_s30  }
 0x476   :  { %s1916_s19 = scalar_lea.vmem %s1652_s27, 32  ;;  %p1921_p7 = scmp.lt.s32.totalorder %s1652_s27, %s1652_s27 }
 0x477   :  { %p1917_p6 = scmp.ne.s32.totalorder %s1652_s27, %s1916_s19  ;;  %p1922_p8 = scmp.lt.s32.totalorder %s1916_s19, %s1916_s19 }
 0x479   :  { %p1923_p9 = por %p1922_p8, %p1921_p7 }
 0x47b   :  { %p1924_p10 = pnand %p1923_p9, %p1917_p6 }
 0x47d   :  { %1927 = shalt.err (!%p1924_p10)
}
 0x47e   :  { %s1958_s6 = smov 1  }
 0x47f   :  { %1657 = dma.vmem_to_hbm [thread:$0]  %s1652_s27, 32, %s2885_s16, [#allocation9], %s1949_s17, %s1949_s17, %s1958_s6  }
 0x480   :  { %1940 = dma.done.wait [#allocation4], 2048  }
 0x481   :  { %1941 = vsyncadd [#allocation4], 4294965248 }
 0x482   :  { %1942 = dma.done.wait [#allocation9], 96  }
 0x483   :  { %1943 = vsyncadd [#allocation9], 4294967200 }
 0x484   :  { %1667 = vsyncpa [#allocation3], 1 }
 0x485   :  { %1668 = vsyncpa [#allocation6], 1 }
 0x486   :  { %1669 = vsyncpa [#allocation4], 1 }
 0x487   :  { %1670 = vsyncpa [#allocation9], 1 }

</bundles_post_ra>
